<compile_context>
chip_gen: v6e
topology: v6e:2x2x1
jax: 0.10.0
libtpu: 0.0.40
codegen_flags: <defaults>
</compile_context>

<pallas_src>
import jax
import jax.numpy as jnp
from jax import lax
from jax.experimental import pallas as pl
from jax.experimental.pallas import tpu as pltpu

# -------------------- model hyper-params (small, consistent with module) -----
B = 2          # batch
N = 8          # nodes
DIN = 16       # input_dim
DOUT = 16      # output_dim
H = 4          # num_heads
HD = H * DOUT  # 64

# -------------------- packed parameter-slab layout (rows, 64 lanes) ----------
P_WIDTH = HD            # 64 lanes
R_W     = 0             # rows   0..15 : fused projection W      (DIN, H*DOUT)
R_GW    = 16            # rows  16..79 : block-diag gate weight  (H*DOUT, H*DOUT)
R_A1B   = 80            # rows  80..143: block a1 matrix         (H*DOUT, H)   lanes 0:H
R_CTW   = 144           # rows 144..159: causal_transform weight (DIN, DIN)    lanes 0:DIN
R_EXTRA = 160           # rows 160..167: cbias*cs + (-inf mask)  (N, N)        lanes 0:N
R_CSM   = 168           # rows 168..175: cs.mean(axis=1)         (N, 1)        lane 0
R_CTB   = 176           # row  176     : causal_transform bias   (1, DIN)      lanes 0:DIN
R_GB    = 184           # row  184     : tiled gate bias         (1, H*DOUT)
R_A2    = 192           # row  192     : flattened a2            (1, H*DOUT)
P_ROWS  = 200


def gat_kernel(x_ref, p_ref, out_ref):
    """One batch element per grid step.

    x_ref   : (N, DIN)          this batch element's node features
    p_ref   : (P_ROWS, 64)      packed constant slab (same block every step)
    out_ref : (N, H*DOUT)       gated, concatenated head outputs
    """
    hp = lax.Precision.HIGHEST

    x = x_ref[...]                                       # (N, DIN) f32

    # static slices into the packed slab (no extra DMA descriptors)
    w_all  = p_ref[R_W:R_W + DIN, :]                     # (DIN, H*DOUT)
    gw     = p_ref[R_GW:R_GW + HD, :]                    # (H*DOUT, H*DOUT)
    a1_blk = p_ref[R_A1B:R_A1B + HD, 0:H]                # (H*DOUT, H)
    ctw    = p_ref[R_CTW:R_CTW + DIN, 0:DIN]             # (DIN, DIN)
    extra  = p_ref[R_EXTRA:R_EXTRA + N, 0:N]             # (N, N)  bias + (-inf) mask
    csm    = p_ref[R_CSM:R_CSM + N, 0:1]                 # (N, 1)  cs row-mean
    ctb    = p_ref[R_CTB:R_CTB + 1, 0:DIN]               # (1, DIN)
    gb     = p_ref[R_GB:R_GB + 1, :]                     # (1, H*DOUT) tiled gate bias
    a2f    = p_ref[R_A2:R_A2 + 1, :]                     # (1, H*DOUT) head-major a2

    # ---- causal feature transform + per-node causal scaling ----------------
    ct = jnp.dot(x, ctw, precision=hp, preferred_element_type=jnp.float32) + ctb
    xs = x + ct * csm                                    # (N, DIN)

    # ---- fused per-head projection: one MXU push ----------------------------
    xt_all = jnp.dot(xs, w_all, precision=hp,
                     preferred_element_type=jnp.float32)  # (N, H*DOUT)

    # ---- "x_i" half of the attention logits for ALL heads in one matmul -----
    s1_all = jnp.dot(xt_all, a1_blk, precision=hp,
                     preferred_element_type=jnp.float32)  # (N, H)

    # ---- per-head attention (static unrolled, H small) ----------------------
    for h in range(H):
        xt_h = xt_all[:, h * DOUT:(h + 1) * DOUT]        # (N, DOUT)
        a2_h = a2f[:, h * DOUT:(h + 1) * DOUT]           # (1, DOUT)

        # "x_j" half: tiny dot_general that directly yields the (1, N) row
        s2 = lax.dot_general(a2_h, xt_h, (((1,), (1,)), ((), ())),
                             precision=hp, preferred_element_type=jnp.float32)
        scores = s1_all[:, h:h + 1] + s2                 # (N, N)

        # leaky relu (slope 0.2), then precomputed causal bias + (-inf) mask
        scores = jnp.where(scores > 0, scores, 0.2 * scores)
        scores = scores + extra

        # softmax over last dim (exact divide for parity with the module)
        m = jnp.max(scores, axis=-1, keepdims=True)
        e = jnp.exp(scores - m)
        attn = e / jnp.sum(e, axis=-1, keepdims=True)

        # aggregation written at a static lane offset (no lane-axis concat)
        out_ref[:, h * DOUT:(h + 1) * DOUT] = jnp.dot(
            attn, xt_h, precision=hp, preferred_element_type=jnp.float32)

    # ---- fused causal gate across heads (block-diagonal weight) -------------
    out_all = out_ref[...]                               # (N, H*DOUT)
    gate = jax.nn.sigmoid(
        jnp.dot(out_all, gw, precision=hp, preferred_element_type=jnp.float32) + gb)
    out_ref[...] = (out_all * gate).astype(out_ref.dtype)  # single full-width store


def causal_gat_forward(x, causal_structure, params):
    """x: (B, N, DIN), causal_structure: (N, N). Returns (B, N, H*DOUT)."""
    w, a1, a2, cbias = params["W"], params["a1"], params["a2"], params["causal_bias"]
    ctw, ctb, gw, gb = params["ct_w"], params["ct_b"], params["gate_w"], params["gate_b"]
    cs = causal_structure

    # ---- wrapper-side layout plumbing ---------------------------------------
    x_flat = x.reshape(B * N, DIN)

    w_all = jnp.transpose(w, (1, 0, 2)).reshape(DIN, HD)        # x @ W_all (head-major cols)
    gw_block = jnp.kron(jnp.eye(H, dtype=gw.dtype), gw)         # block-diag gate weight
    # a1_blk[h*DOUT+d, h] = a1[h, d]  (so xt_all @ a1_blk gives per-head s1)
    a1_blk = (jnp.eye(H, dtype=a1.dtype)[:, None, :] * a1[:, :, None]).reshape(HD, H)

    cs_mean = jnp.mean(cs, axis=1, keepdims=True)               # (N, 1)
    # causal bias + adjacency mask (adj := causal_structure), exact masked_fill(-inf)
    extra = cbias[0] * cs + jnp.where(cs == 0.0, -jnp.inf, 0.0)  # (N, N)

    # ---- pack all constant operands into ONE lane-dense slab ----------------
    slab = jnp.zeros((P_ROWS, P_WIDTH), jnp.float32)
    slab = slab.at[R_W:R_W + DIN, :].set(w_all)
    slab = slab.at[R_GW:R_GW + HD, :].set(gw_block)
    slab = slab.at[R_A1B:R_A1B + HD, 0:H].set(a1_blk)
    slab = slab.at[R_CTW:R_CTW + DIN, 0:DIN].set(ctw)
    slab = slab.at[R_EXTRA:R_EXTRA + N, 0:N].set(extra)
    slab = slab.at[R_CSM:R_CSM + N, 0:1].set(cs_mean)
    slab = slab.at[R_CTB, 0:DIN].set(ctb[0])
    slab = slab.at[R_GB, :].set(jnp.tile(gb, (1, H))[0])
    slab = slab.at[R_A2, :].set(a2.reshape(HD))

    out_flat = pl.pallas_call(
        gat_kernel,
        out_shape=jax.ShapeDtypeStruct((B * N, HD), jnp.float32),
        grid_spec=pltpu.PrefetchScalarGridSpec(
            num_scalar_prefetch=0,
            grid=(B,),                                           # one batch element / step
            in_specs=[
                pl.BlockSpec((N, DIN), lambda b: (b, 0)),        # this batch's nodes
                pl.BlockSpec((P_ROWS, P_WIDTH), lambda b: (0, 0)),  # packed constants
            ],
            out_specs=pl.BlockSpec((N, HD), lambda b: (b, 0)),
        ),
        compiler_params=pltpu.CompilerParams(
            dimension_semantics=("parallel",)),                  # both TCs on v7x
    )(x_flat, slab)
    return out_flat.reshape(B, N, HD)


def reference_forward(x, cs, params):
    """Pure-JAX reference mirroring the PyTorch module (eval mode, adj=None)."""
    w, a1, a2, cbias = params["W"], params["a1"], params["a2"], params["causal_bias"]
    ctw, ctb, gw, gb = params["ct_w"], params["ct_b"], params["gate_w"], params["gate_b"]
    hp = lax.Precision.HIGHEST

    ct = jnp.einsum("bni,io->bno", x, ctw, precision=hp) + ctb          # Linear
    xm = x + ct * jnp.mean(cs, axis=1, keepdims=True)                   # (N,1) broadcast
    xt = jnp.einsum("bni,hio->bhno", xm, w, precision=hp)               # (B,H,N,DOUT)
    s1 = jnp.einsum("bhno,ho->bhn", xt, a1, precision=hp)
    s2 = jnp.einsum("bhno,ho->bhn", xt, a2, precision=hp)
    scores = s1[:, :, :, None] + s2[:, :, None, :]
    scores = jnp.where(scores > 0, scores, 0.2 * scores)
    scores = scores + cbias[0] * cs[None, None]
    scores = jnp.where(cs[None, None] == 0, -jnp.inf, scores)
    attn = jax.nn.softmax(scores, axis=-1)
    out = jnp.einsum("bhij,bhjo->bhio", attn, xt, precision=hp)
    gate = jax.nn.sigmoid(jnp.einsum("bhio,op->bhip", out, gw, precision=hp) + gb)
    out = out * gate
    out = jnp.transpose(out, (0, 2, 1, 3)).reshape(B, N, HD)
    return out


def make_params(key):
    ks = jax.random.split(key, 8)
    xav = lambda k, shape, fi, fo: jax.random.uniform(
        k, shape, jnp.float32, -1.0, 1.0) * jnp.sqrt(6.0 / (fi + fo))
    a_full = xav(ks[1], (H, 2 * DOUT), 2 * DOUT, 1)   # attention param (H, 2*DOUT, 1) squeezed
    return {
        "W": xav(ks[0], (H, DIN, DOUT), DIN, DOUT),
        "a1": a_full[:, :DOUT],
        "a2": a_full[:, DOUT:],
        "causal_bias": jnp.full((1,), 0.1, jnp.float32),       # nonzero -> bias path exercised
        "ct_w": xav(ks[2], (DIN, DIN), DIN, DIN),              # stored as x @ W layout
        "ct_b": xav(ks[3], (1, DIN), DIN, DIN) * 0.1,
        "gate_w": xav(ks[4], (DOUT, DOUT), DOUT, DOUT),        # stored as y @ W layout
        "gate_b": xav(ks[5], (1, DOUT), DOUT, DOUT) * 0.1,
    }


if __name__ == "__main__":
    key = jax.random.PRNGKey(0)
    k_x, k_cs, k_p = jax.random.split(key, 3)

    x = jax.random.normal(k_x, (B, N, DIN), jnp.float32)
    # causal structure: binary with self-loops so no row is fully masked
    cs = (jax.random.uniform(k_cs, (N, N)) > 0.4).astype(jnp.float32)
    cs = jnp.maximum(cs, jnp.eye(N, dtype=jnp.float32))

    params = make_params(k_p)

    out = causal_gat_forward(x, cs, params)
    out = jax.block_until_ready(out)

    ref = reference_forward(x, cs, params)
    assert out.shape == (B, N, HD)
    assert bool(jnp.all(jnp.isfinite(out)))
    assert bool(jnp.allclose(out, ref, atol=2e-3, rtol=2e-3)), (
        float(jnp.max(jnp.abs(out - ref))))

    print("KERNEL_OK")
</pallas_src>

<mosaic_0001>
module attributes {stable_mosaic.version = 11 : i64} {
  func.func @gat_kernel(%arg0: i32, %arg1: memref<8x16xf32, #tpu.memory_space<vmem>>, %arg2: memref<200x64xf32, #tpu.memory_space<vmem>>, %arg3: memref<8x64xf32, #tpu.memory_space<vmem>>) attributes {dimension_semantics = [#tpu.dimension_semantics<parallel>], iteration_bounds = array<i64: 2>, scalar_prefetch = 0 : i64, scratch_operands = 0 : i64, tpu.core_type = #tpu.core_type<tc>, window_params = [{transform_indices = @transform_0, window_bounds = array<i64: 8, 16>}, {pipeline_mode = #tpu.pipeline_mode<synchronous>, transform_indices = @transform_1, window_bounds = array<i64: 200, 64>}, {transform_indices = @transform_2, window_bounds = array<i64: 8, 64>}]} {
    %c0 = arith.constant 0 : index
    %c0_0 = arith.constant 0 : index
    %0 = vector.load %arg1[%c0, %c0_0] : memref<8x16xf32, #tpu.memory_space<vmem>>, vector<8x16xf32>
    %c0_1 = arith.constant 0 : index
    %c0_2 = arith.constant 0 : index
    %1 = vector.load %arg2[%c0_1, %c0_2] : memref<200x64xf32, #tpu.memory_space<vmem>>, vector<16x64xf32>
    %c16 = arith.constant 16 : index
    %c0_3 = arith.constant 0 : index
    %2 = vector.load %arg2[%c16, %c0_3] : memref<200x64xf32, #tpu.memory_space<vmem>>, vector<64x64xf32>
    %c80 = arith.constant 80 : index
    %c0_4 = arith.constant 0 : index
    %3 = vector.load %arg2[%c80, %c0_4] : memref<200x64xf32, #tpu.memory_space<vmem>>, vector<64x4xf32>
    %c144 = arith.constant 144 : index
    %c0_5 = arith.constant 0 : index
    %4 = vector.load %arg2[%c144, %c0_5] : memref<200x64xf32, #tpu.memory_space<vmem>>, vector<16x16xf32>
    %c160 = arith.constant 160 : index
    %c0_6 = arith.constant 0 : index
    %5 = vector.load %arg2[%c160, %c0_6] : memref<200x64xf32, #tpu.memory_space<vmem>>, vector<8x8xf32>
    %c168 = arith.constant 168 : index
    %c0_7 = arith.constant 0 : index
    %6 = vector.load %arg2[%c168, %c0_7] : memref<200x64xf32, #tpu.memory_space<vmem>>, vector<8x1xf32>
    %c176 = arith.constant 176 : index
    %c0_8 = arith.constant 0 : index
    %7 = vector.load %arg2[%c176, %c0_8] : memref<200x64xf32, #tpu.memory_space<vmem>>, vector<1x16xf32>
    %c184 = arith.constant 184 : index
    %c0_9 = arith.constant 0 : index
    %8 = vector.load %arg2[%c184, %c0_9] : memref<200x64xf32, #tpu.memory_space<vmem>>, vector<1x64xf32>
    %c192 = arith.constant 192 : index
    %c0_10 = arith.constant 0 : index
    %9 = vector.load %arg2[%c192, %c0_10] : memref<200x64xf32, #tpu.memory_space<vmem>>, vector<1x64xf32>
    %cst = arith.constant dense<0.000000e+00> : vector<8x16xf32>
    %10 = tpu.matmul %0, %4, %cst {dimension_numbers = #tpu.dot_dimension_numbers<[1], [0], [0], [1], [0, 0, 1, 1], [], []>, precision = #tpu.contract_precision<fp32>} : vector<8x16xf32>, vector<16x16xf32>, vector<8x16xf32> -> vector<8x16xf32>
    %11 = vector.broadcast %7 : vector<1x16xf32> to vector<8x16xf32>
    %12 = arith.addf %10, %11 : vector<8x16xf32>
    %13 = vector.broadcast %6 : vector<8x1xf32> to vector<8x16xf32>
    %14 = arith.mulf %12, %13 : vector<8x16xf32>
    %15 = arith.addf %0, %14 : vector<8x16xf32>
    %cst_11 = arith.constant dense<0.000000e+00> : vector<8x64xf32>
    %16 = tpu.matmul %15, %1, %cst_11 {dimension_numbers = #tpu.dot_dimension_numbers<[1], [0], [0], [1], [0, 0, 1, 1], [], []>, precision = #tpu.contract_precision<fp32>} : vector<8x16xf32>, vector<16x64xf32>, vector<8x64xf32> -> vector<8x64xf32>
    %cst_12 = arith.constant dense<0.000000e+00> : vector<8x4xf32>
    %17 = tpu.matmul %16, %3, %cst_12 {dimension_numbers = #tpu.dot_dimension_numbers<[1], [0], [0], [1], [0, 0, 1, 1], [], []>, precision = #tpu.contract_precision<fp32>} : vector<8x64xf32>, vector<64x4xf32>, vector<8x4xf32> -> vector<8x4xf32>
    %18 = vector.extract_strided_slice %16 {offsets = [0, 0], sizes = [8, 16], strides = [1, 1]} : vector<8x64xf32> to vector<8x16xf32>
    %19 = vector.extract_strided_slice %9 {offsets = [0, 0], sizes = [1, 16], strides = [1, 1]} : vector<1x64xf32> to vector<1x16xf32>
    %cst_13 = arith.constant dense<0.000000e+00> : vector<1x8xf32>
    %20 = tpu.matmul %19, %18, %cst_13 {dimension_numbers = #tpu.dot_dimension_numbers<[1], [1], [0], [0], [0, 0, 1, 0], [], []>, precision = #tpu.contract_precision<fp32>} : vector<1x16xf32>, vector<8x16xf32>, vector<1x8xf32> -> vector<1x8xf32>
    %21 = vector.extract_strided_slice %17 {offsets = [0, 0], sizes = [8, 1], strides = [1, 1]} : vector<8x4xf32> to vector<8x1xf32>
    %22 = vector.broadcast %21 : vector<8x1xf32> to vector<8x8xf32>
    %23 = vector.broadcast %20 : vector<1x8xf32> to vector<8x8xf32>
    %24 = arith.addf %22, %23 : vector<8x8xf32>
    %cst_14 = arith.constant 0.000000e+00 : f32
    %25 = vector.broadcast %cst_14 : f32 to vector<8x8xf32>
    %26 = arith.cmpf ogt, %24, %25 : vector<8x8xf32>
    %cst_15 = arith.constant 2.000000e-01 : f32
    %27 = vector.broadcast %cst_15 : f32 to vector<8x8xf32>
    %28 = arith.mulf %27, %24 : vector<8x8xf32>
    %29 = arith.select %26, %24, %28 : vector<8x8xi1>, vector<8x8xf32>
    %30 = arith.addf %29, %5 : vector<8x8xf32>
    %cst_16 = arith.constant dense<0xFF800000> : vector<8xf32>
    %31 = vector.multi_reduction <maximumf>, %30, %cst_16 [1] : vector<8x8xf32> to vector<8xf32>
    %32 = vector.shape_cast %31 : vector<8xf32> to vector<8x1xf32>
    %33 = vector.broadcast %32 : vector<8x1xf32> to vector<8x8xf32>
    %34 = arith.subf %30, %33 : vector<8x8xf32>
    %35 = math.exp %34 : vector<8x8xf32>
    %cst_17 = arith.constant dense<0.000000e+00> : vector<8xf32>
    %36 = vector.multi_reduction <add>, %35, %cst_17 [1] : vector<8x8xf32> to vector<8xf32>
    %37 = vector.shape_cast %36 : vector<8xf32> to vector<8x1xf32>
    %38 = vector.broadcast %37 : vector<8x1xf32> to vector<8x8xf32>
    %39 = arith.divf %35, %38 : vector<8x8xf32>
    %cst_18 = arith.constant dense<0.000000e+00> : vector<8x16xf32>
    %40 = tpu.matmul %39, %18, %cst_18 {dimension_numbers = #tpu.dot_dimension_numbers<[1], [0], [0], [1], [0, 0, 1, 1], [], []>, precision = #tpu.contract_precision<fp32>} : vector<8x8xf32>, vector<8x16xf32>, vector<8x16xf32> -> vector<8x16xf32>
    %c0_19 = arith.constant 0 : index
    %c0_20 = arith.constant 0 : index
    %41 = vector.load %arg3[%c0_19, %c0_20] : memref<8x64xf32, #tpu.memory_space<vmem>>, vector<8x16xf32>
    tpu.vector_store %arg3[%c0_19, %c0_20], %40 {strides = array<i32>} : memref<8x64xf32, #tpu.memory_space<vmem>>, vector<8x16xf32>,
    %42 = vector.extract_strided_slice %16 {offsets = [0, 16], sizes = [8, 16], strides = [1, 1]} : vector<8x64xf32> to vector<8x16xf32>
    %43 = vector.extract_strided_slice %9 {offsets = [0, 16], sizes = [1, 16], strides = [1, 1]} : vector<1x64xf32> to vector<1x16xf32>
    %cst_21 = arith.constant dense<0.000000e+00> : vector<1x8xf32>
    %44 = tpu.matmul %43, %42, %cst_21 {dimension_numbers = #tpu.dot_dimension_numbers<[1], [1], [0], [0], [0, 0, 1, 0], [], []>, precision = #tpu.contract_precision<fp32>} : vector<1x16xf32>, vector<8x16xf32>, vector<1x8xf32> -> vector<1x8xf32>
    %45 = vector.extract_strided_slice %17 {offsets = [0, 1], sizes = [8, 1], strides = [1, 1]} : vector<8x4xf32> to vector<8x1xf32>
    %46 = vector.broadcast %45 : vector<8x1xf32> to vector<8x8xf32>
    %47 = vector.broadcast %44 : vector<1x8xf32> to vector<8x8xf32>
    %48 = arith.addf %46, %47 : vector<8x8xf32>
    %cst_22 = arith.constant 0.000000e+00 : f32
    %49 = vector.broadcast %cst_22 : f32 to vector<8x8xf32>
    %50 = arith.cmpf ogt, %48, %49 : vector<8x8xf32>
    %cst_23 = arith.constant 2.000000e-01 : f32
    %51 = vector.broadcast %cst_23 : f32 to vector<8x8xf32>
    %52 = arith.mulf %51, %48 : vector<8x8xf32>
    %53 = arith.select %50, %48, %52 : vector<8x8xi1>, vector<8x8xf32>
    %54 = arith.addf %53, %5 : vector<8x8xf32>
    %cst_24 = arith.constant dense<0xFF800000> : vector<8xf32>
    %55 = vector.multi_reduction <maximumf>, %54, %cst_24 [1] : vector<8x8xf32> to vector<8xf32>
    %56 = vector.shape_cast %55 : vector<8xf32> to vector<8x1xf32>
    %57 = vector.broadcast %56 : vector<8x1xf32> to vector<8x8xf32>
    %58 = arith.subf %54, %57 : vector<8x8xf32>
    %59 = math.exp %58 : vector<8x8xf32>
    %cst_25 = arith.constant dense<0.000000e+00> : vector<8xf32>
    %60 = vector.multi_reduction <add>, %59, %cst_25 [1] : vector<8x8xf32> to vector<8xf32>
    %61 = vector.shape_cast %60 : vector<8xf32> to vector<8x1xf32>
    %62 = vector.broadcast %61 : vector<8x1xf32> to vector<8x8xf32>
    %63 = arith.divf %59, %62 : vector<8x8xf32>
    %cst_26 = arith.constant dense<0.000000e+00> : vector<8x16xf32>
    %64 = tpu.matmul %63, %42, %cst_26 {dimension_numbers = #tpu.dot_dimension_numbers<[1], [0], [0], [1], [0, 0, 1, 1], [], []>, precision = #tpu.contract_precision<fp32>} : vector<8x8xf32>, vector<8x16xf32>, vector<8x16xf32> -> vector<8x16xf32>
    %c0_27 = arith.constant 0 : index
    %c16_28 = arith.constant 16 : index
    %65 = vector.load %arg3[%c0_27, %c16_28] : memref<8x64xf32, #tpu.memory_space<vmem>>, vector<8x16xf32>
    tpu.vector_store %arg3[%c0_27, %c16_28], %64 {strides = array<i32>} : memref<8x64xf32, #tpu.memory_space<vmem>>, vector<8x16xf32>,
    %66 = vector.extract_strided_slice %16 {offsets = [0, 32], sizes = [8, 16], strides = [1, 1]} : vector<8x64xf32> to vector<8x16xf32>
    %67 = vector.extract_strided_slice %9 {offsets = [0, 32], sizes = [1, 16], strides = [1, 1]} : vector<1x64xf32> to vector<1x16xf32>
    %cst_29 = arith.constant dense<0.000000e+00> : vector<1x8xf32>
    %68 = tpu.matmul %67, %66, %cst_29 {dimension_numbers = #tpu.dot_dimension_numbers<[1], [1], [0], [0], [0, 0, 1, 0], [], []>, precision = #tpu.contract_precision<fp32>} : vector<1x16xf32>, vector<8x16xf32>, vector<1x8xf32> -> vector<1x8xf32>
    %69 = vector.extract_strided_slice %17 {offsets = [0, 2], sizes = [8, 1], strides = [1, 1]} : vector<8x4xf32> to vector<8x1xf32>
    %70 = vector.broadcast %69 : vector<8x1xf32> to vector<8x8xf32>
    %71 = vector.broadcast %68 : vector<1x8xf32> to vector<8x8xf32>
    %72 = arith.addf %70, %71 : vector<8x8xf32>
    %cst_30 = arith.constant 0.000000e+00 : f32
    %73 = vector.broadcast %cst_30 : f32 to vector<8x8xf32>
    %74 = arith.cmpf ogt, %72, %73 : vector<8x8xf32>
    %cst_31 = arith.constant 2.000000e-01 : f32
    %75 = vector.broadcast %cst_31 : f32 to vector<8x8xf32>
    %76 = arith.mulf %75, %72 : vector<8x8xf32>
    %77 = arith.select %74, %72, %76 : vector<8x8xi1>, vector<8x8xf32>
    %78 = arith.addf %77, %5 : vector<8x8xf32>
    %cst_32 = arith.constant dense<0xFF800000> : vector<8xf32>
    %79 = vector.multi_reduction <maximumf>, %78, %cst_32 [1] : vector<8x8xf32> to vector<8xf32>
    %80 = vector.shape_cast %79 : vector<8xf32> to vector<8x1xf32>
    %81 = vector.broadcast %80 : vector<8x1xf32> to vector<8x8xf32>
    %82 = arith.subf %78, %81 : vector<8x8xf32>
    %83 = math.exp %82 : vector<8x8xf32>
    %cst_33 = arith.constant dense<0.000000e+00> : vector<8xf32>
    %84 = vector.multi_reduction <add>, %83, %cst_33 [1] : vector<8x8xf32> to vector<8xf32>
    %85 = vector.shape_cast %84 : vector<8xf32> to vector<8x1xf32>
    %86 = vector.broadcast %85 : vector<8x1xf32> to vector<8x8xf32>
    %87 = arith.divf %83, %86 : vector<8x8xf32>
    %cst_34 = arith.constant dense<0.000000e+00> : vector<8x16xf32>
    %88 = tpu.matmul %87, %66, %cst_34 {dimension_numbers = #tpu.dot_dimension_numbers<[1], [0], [0], [1], [0, 0, 1, 1], [], []>, precision = #tpu.contract_precision<fp32>} : vector<8x8xf32>, vector<8x16xf32>, vector<8x16xf32> -> vector<8x16xf32>
    %c0_35 = arith.constant 0 : index
    %c32 = arith.constant 32 : index
    %89 = vector.load %arg3[%c0_35, %c32] : memref<8x64xf32, #tpu.memory_space<vmem>>, vector<8x16xf32>
    tpu.vector_store %arg3[%c0_35, %c32], %88 {strides = array<i32>} : memref<8x64xf32, #tpu.memory_space<vmem>>, vector<8x16xf32>,
    %90 = vector.extract_strided_slice %16 {offsets = [0, 48], sizes = [8, 16], strides = [1, 1]} : vector<8x64xf32> to vector<8x16xf32>
    %91 = vector.extract_strided_slice %9 {offsets = [0, 48], sizes = [1, 16], strides = [1, 1]} : vector<1x64xf32> to vector<1x16xf32>
    %cst_36 = arith.constant dense<0.000000e+00> : vector<1x8xf32>
    %92 = tpu.matmul %91, %90, %cst_36 {dimension_numbers = #tpu.dot_dimension_numbers<[1], [1], [0], [0], [0, 0, 1, 0], [], []>, precision = #tpu.contract_precision<fp32>} : vector<1x16xf32>, vector<8x16xf32>, vector<1x8xf32> -> vector<1x8xf32>
    %93 = vector.extract_strided_slice %17 {offsets = [0, 3], sizes = [8, 1], strides = [1, 1]} : vector<8x4xf32> to vector<8x1xf32>
    %94 = vector.broadcast %93 : vector<8x1xf32> to vector<8x8xf32>
    %95 = vector.broadcast %92 : vector<1x8xf32> to vector<8x8xf32>
    %96 = arith.addf %94, %95 : vector<8x8xf32>
    %cst_37 = arith.constant 0.000000e+00 : f32
    %97 = vector.broadcast %cst_37 : f32 to vector<8x8xf32>
    %98 = arith.cmpf ogt, %96, %97 : vector<8x8xf32>
    %cst_38 = arith.constant 2.000000e-01 : f32
    %99 = vector.broadcast %cst_38 : f32 to vector<8x8xf32>
    %100 = arith.mulf %99, %96 : vector<8x8xf32>
    %101 = arith.select %98, %96, %100 : vector<8x8xi1>, vector<8x8xf32>
    %102 = arith.addf %101, %5 : vector<8x8xf32>
    %cst_39 = arith.constant dense<0xFF800000> : vector<8xf32>
    %103 = vector.multi_reduction <maximumf>, %102, %cst_39 [1] : vector<8x8xf32> to vector<8xf32>
    %104 = vector.shape_cast %103 : vector<8xf32> to vector<8x1xf32>
    %105 = vector.broadcast %104 : vector<8x1xf32> to vector<8x8xf32>
    %106 = arith.subf %102, %105 : vector<8x8xf32>
    %107 = math.exp %106 : vector<8x8xf32>
    %cst_40 = arith.constant dense<0.000000e+00> : vector<8xf32>
    %108 = vector.multi_reduction <add>, %107, %cst_40 [1] : vector<8x8xf32> to vector<8xf32>
    %109 = vector.shape_cast %108 : vector<8xf32> to vector<8x1xf32>
    %110 = vector.broadcast %109 : vector<8x1xf32> to vector<8x8xf32>
    %111 = arith.divf %107, %110 : vector<8x8xf32>
    %cst_41 = arith.constant dense<0.000000e+00> : vector<8x16xf32>
    %112 = tpu.matmul %111, %90, %cst_41 {dimension_numbers = #tpu.dot_dimension_numbers<[1], [0], [0], [1], [0, 0, 1, 1], [], []>, precision = #tpu.contract_precision<fp32>} : vector<8x8xf32>, vector<8x16xf32>, vector<8x16xf32> -> vector<8x16xf32>
    %c0_42 = arith.constant 0 : index
    %c48 = arith.constant 48 : index
    %113 = vector.load %arg3[%c0_42, %c48] : memref<8x64xf32, #tpu.memory_space<vmem>>, vector<8x16xf32>
    tpu.vector_store %arg3[%c0_42, %c48], %112 {strides = array<i32>} : memref<8x64xf32, #tpu.memory_space<vmem>>, vector<8x16xf32>,
    %c0_43 = arith.constant 0 : index
    %c0_44 = arith.constant 0 : index
    %114 = vector.load %arg3[%c0_43, %c0_44] : memref<8x64xf32, #tpu.memory_space<vmem>>, vector<8x64xf32>
    %cst_45 = arith.constant dense<0.000000e+00> : vector<8x64xf32>
    %115 = tpu.matmul %114, %2, %cst_45 {dimension_numbers = #tpu.dot_dimension_numbers<[1], [0], [0], [1], [0, 0, 1, 1], [], []>, precision = #tpu.contract_precision<fp32>} : vector<8x64xf32>, vector<64x64xf32>, vector<8x64xf32> -> vector<8x64xf32>
    %116 = vector.broadcast %8 : vector<1x64xf32> to vector<8x64xf32>
    %117 = arith.addf %115, %116 : vector<8x64xf32>
    %118 = arith.negf %117 : vector<8x64xf32>
    %119 = math.exp %118 : vector<8x64xf32>
    %cst_46 = arith.constant 1.000000e+00 : f32
    %120 = vector.broadcast %cst_46 : f32 to vector<8x64xf32>
    %121 = arith.addf %120, %119 : vector<8x64xf32>
    %122 = arith.divf %120, %121 : vector<8x64xf32>
    %123 = arith.mulf %114, %122 : vector<8x64xf32>
    %c0_47 = arith.constant 0 : index
    %c0_48 = arith.constant 0 : index
    %124 = vector.load %arg3[%c0_47, %c0_48] : memref<8x64xf32, #tpu.memory_space<vmem>>, vector<8x64xf32>
    tpu.vector_store %arg3[%c0_47, %c0_48], %123 {strides = array<i32>} : memref<8x64xf32, #tpu.memory_space<vmem>>, vector<8x64xf32>,
    return
  }
  func.func @transform_0(%arg0: i32) -> (i32, i32) {
    %c0_i32 = arith.constant 0 : i32
    %c0_i32_0 = arith.constant 0 : i32
    return %arg0, %c0_i32 : i32, i32
  }
  func.func @transform_1(%arg0: i32) -> (i32, i32) {
    %c0_i32 = arith.constant 0 : i32
    %c0_i32_0 = arith.constant 0 : i32
    %c0_i32_1 = arith.constant 0 : i32
    return %c0_i32, %c0_i32_0 : i32, i32
  }
  func.func @transform_2(%arg0: i32) -> (i32, i32) {
    %c0_i32 = arith.constant 0 : i32
    %c0_i32_0 = arith.constant 0 : i32
    return %arg0, %c0_i32 : i32, i32
  }
}

</mosaic_0001>

<bundles_post_ra>
// kernel: tpu_custom_call.1
= control target key start
LH: loop header
LB: loop body
LE: loop exit
PB: predicated region body
PF: predicated region fallthrough
CT: control target
= control target key end

     0   :  { %7 = vsyncpa [#allocation3], 0  ;;  %s7875_s0 = inlined_call_operand.vmem [shape: f32[16,16], index: 0, kind: input, shape index: {}]   ;;  %s7876_s1 = inlined_call_operand.vmem [shape: f32[200,64], index: 1, kind: input, shape index: {}]   ;;  %s7877_s2 = inlined_call_operand.hbm [shape: f32[16,64], index: 2, kind: output, shape index: {}]  }
   0x1   :  { %9 = vsyncpa [#allocation3 + $0x1], 0  ;;  %s6968_s9 = smov 0   ;;  %s6970_s10 = smov 0  }
   0x2   :  { %s6972_s11 = smov 0   ;;  %s6974_s12 = smov 0  }
   0x3 LB: > { %s6989_s13 = sadd.s32 4294967295, %s6938_s12   ;;  %s5997_s14 = sadd.s32 4294967294, %s6938_s12   ;;  %s6938_s12 = sphi %s6974_s12, %s7883_s12   ;;  %s6934_s11 = sphi %s6972_s11, %s7882_s11   ;;  %s6930_s10 = sphi %s6970_s10, %s7881_s10   ;;  %s6926_s9 = sphi %s6968_s9, %s7880_s9  }
   0x4   : > { %s6993_s15 = sadd.s32 1, %s6938_s12   ;;  %s69_s16 = sadd.s32 1, %s6934_s11 }
   0x5   : > { %s66_s17 = ssub.s32 %s6938_s12, %s6993_s15  ;;  %p79_p0 = scmp.ne.s32.totalorder %s6934_s11, %s6930_s10 }
   0x6   : > { %p67_p1 = scmp.eq.s32.totalorder %s66_s17, 0  ;;  %p80_p2 = scmp.eq.s32.totalorder %s6989_s13, 1 }
   0x7   : > { %p85_p3 = scmp.ne.s32.totalorder %s6930_s10, %s6926_s9  ;;  %p86_p4 = scmp.eq.s32.totalorder %s5997_s14, 1 }
   0x8   : > { %s7004_s18 = scalar_select %p67_p1, %s6934_s11, %s69_s16  }
   0x9   : > { %p7006_p5 = por %p80_p2, %p79_p0  ;;  %p7010_p6 = por %p86_p4, %p85_p3 }
   0xa   : > { %p6000_p7 = scmp.ge.s32.totalorder %s6938_s12, 1  ;;  %p114_p8 = scmp.lt.s32.totalorder %s6938_s12, 3 }
   0xc   : > { %p115_p9 = pnand %p6000_p7, %p114_p8 }
   0xd   : > { %p135_p10 = scmp.lt.s32.totalorder (!%p115_p9), %s6989_s13, 1  ;;  %s6943_s14 = smov (!%p115_p9), 112  }
   0xe   : > { %118 = sbr.rel (%p115_p9) target bundleno = 3421 (0xd5d), region = 28  ;;  %s132_s21 = sand.u32 (!%p115_p9), 1, %s6930_s10  }
   0xf   : > { %s6001_s22 = sshll.u32 (!%p115_p9), %s132_s21, 3  ;;  %s6946_s24 = smov (!%p115_p9), 96  }
  0x10   : > { %s7456_s23 = scalar_lea.vmem (!%p115_p9), [#allocation2], %s6001_s22  ;;  %s6948_s25 = smov (!%p115_p9), 80  }
  0x11   : > { %s6949_s26 = smov (!%p115_p9), 16   ;;  %s6007_s30 = sshll.u32 (!%p115_p9), %s6989_s13, 7 }
  0x12   : > { %s5936_s6 = scalar_lea.hbm (!%p115_p9), %s7877_s2, %s6007_s30  ;;  %s5925_s7 = scalar_lea.sflag (!%p115_p9), [#allocation3], %s132_s21 }
  0x13   : > { %v159_v0 = vld [vmem:[%s7876_s1 + $0x98] sm:$0xff]  ;;  %v158_v1 = vld [vmem:[%s7876_s1 + $0x90] sm:$0xff]  ;;  %v6940_v2 = vmov 0.0   ;;  %v161_v5 = vld [vmem:[%s7876_s1 + $0xa8] sm:$0xff]  ;;  %vm6941_vm0 = vmmov 0   ;;  %s136_s27 = scalar_select %p135_p10, %s6989_s13, 1 }
  0x14   : > { %6250 = vmatprep.subr.mxu0 %v6940_v2  ;;  %v202_v3 = vand.u32 4294901760, %v159_v0  ;;  %6257 = vmatprep.subr.mxu1 %v6940_v2  ;;  %v205_v4 = vand.u32 4294901760, %v158_v1  ;;  %v6942_v8 = vmov 0   ;;  %vm169_vm1 = vcmask 130048   ;;  %v141_v22 = vld [vmem:[%s7876_s1 + $0x8] sm:$0xff]  ;;  %v140_v24 = vld [vmem:[%s7876_s1] sm:$0xff] }
  0x15   : > { %6254 = vmatprep.mubr.msk.f32.mxu0 %vm6941_vm0, %v6940_v2  ;;  %6261 = vmatprep.mubr.msk.f32.mxu1 %vm6941_vm0, %v6940_v2  ;;  %s6002_s28 = sshll.u32 %s136_s27, 3  ;;  %v671_v23 = vand.u32 4294901760, %v141_v22  ;;  %v674_v26 = vand.u32 4294901760, %v140_v24  ;;  %v6003_v35 = vld [vmem:[%s7876_s1 + $0xb0] ss:$0 sm:$0xff]  ;;  %v157_v62 = vld [vmem:[%s7876_s1 + $0x88] sm:$0xff] }
  0x16   : > { %6251 = vmatpush3.msra.mxu0 %v202_v3  ;;  %v280_v6 = vsub.f32 %v159_v0, %v202_v3  ;;  %v287_v7 = vsub.f32 %v158_v1, %v205_v4  ;;  %6853 = vset.pattern.permute.xlu0 %v6942_v8  ;;  %s138_s3 = scalar_lea.vmem %s7875_s0, %s6002_s28  ;;  %v7112_v63 = vand.u32 4294901760, %v157_v62  ;;  %v156_v0 = vld [vmem:[%s7876_s1 + $0x80] sm:$0xff]  ;;  %v154_v8 = vld [vmem:[%s7876_s1 + $0x70] sm:$0xff]  ;;  %vm1101_vm2 = vcmask 523264   ;;  %s6950_s27 = smov 32  }
  0x17   : > { %6252 = vmatprep.subr.mxu0 %v6940_v2  ;;  %634 = vperm.xlu0 %6853, %v161_v5   ;;  %v7038_v11 = vld [vmem:[%s138_s3] sm:$0xff]  ;;  %v7070_v25 = vsub.f32 %v141_v22, %v671_v23  ;;  %v7074_v28 = vsub.f32 %v140_v24, %v674_v26  ;;  %vm2107_vm4 = vcmask 64512   ;;  %vm3501_vm8 = vcmask 261248   ;;  %s5938_s3 = sshll.u32 %s7456_s23, 4  ;;  %s5939_s3 = int_to_ptr.vmem [resolvable:$true] %s5938_s3 }
  0x18   : > { %v281_v9 = vand.u32 4294901760, %v280_v6  ;;  %6253 = vmatpush3.msra.mxu0 %v205_v4  ;;  %v288_v10 = vand.u32 4294901760, %v287_v7  ;;  %v171_v14 = vsel %vm169_vm1, %v7038_v11, 0  ;;  %v7118_v1 = vsub.f32 %v157_v62, %v7112_v63  ;;  %s6878_s8 = scalar_lea.vmem %s5939_s3, 128 }
  0x19   : > { %6264 = vmatprep.subr.mxu0 %v6940_v2  ;;  %v240_v15 = vand.u32 4294901760, %v171_v14  ;;  %v750_v27 = vand.u32 4294901760, %v7070_v25  ;;  %v757_v30 = vand.u32 4294901760, %v7074_v28  ;;  %vm4435_vm9 = vcmask 392448   ;;  %p6879_p11 = scmp.ne.s32.totalorder %s5939_s3, %s6878_s8 }
  0x1a   : > { %v282_v12 = vsub.f32 %v280_v6, %v281_v9  ;;  %v289_v13 = vsub.f32 %v287_v7, %v288_v10  ;;  %v1207_v5 = vand.u32 4294901760, %v7118_v1  ;;  %vm5369_vm10 = vcmask 523648  }
  0x1b   : > { %v241_v18 = vsub.f32 %v171_v14, %v240_v15  ;;  %v751_v29 = vsub.f32 %v7070_v25, %v750_v27  ;;  %v758_v32 = vsub.f32 %v7074_v28, %v757_v30  ;;  %p6880_p12 = pnand %p6879_p11, %p7006_p5 }
  0x1c   : > { %v283_v16 = vand.u32 4294901760, %v282_v12  ;;  %v290_v17 = vand.u32 4294901760, %v289_v13  ;;  %v7145_v12 = vand.u32 4294901760, %v154_v8  ;;  %v153_v13 = vld [vmem:[%s7876_s1 + $0x68] sm:$0xff] }
  0x1d   : > { %v242_v19 = vand.u32 4294901760, %v241_v18  ;;  %v752_v31 = vand.u32 4294901760, %v751_v29  ;;  %v759_v33 = vand.u32 4294901760, %v758_v32  ;;  %p6881_p13 = pneg %p6880_p12 }
  0x1e   : > { %6258 = vmatpush3.msra.mxu1 %v283_v16 }
  0x1f   : > { %6259 = vmatprep.subr.mxu1 %v6940_v2  ;;  %v243_v20 = vsub.f32 %v241_v18, %v242_v19 }
  0x20   : > { %6260 = vmatpush3.msra.mxu1 %v290_v17  ;;  %v7157_v17 = vsub.f32 %v154_v8, %v7145_v12 }
  0x21   : > { %6262 = vmatmul.mubr.f32.vlgmr.msra.gmra.mxu1 %v240_v15  ;;  %6271 = vmatprep.subr.mxu1 %v6940_v2  ;;  %v244_v21 = vand.u32 4294901760, %v243_v20 }
  0x22   : > { %6272 = vmatpush3.msra.mxu1 %v202_v3  ;;  %6275 = vmatprep.mubr.msk.f32.mxu1 %vm6941_vm0, %v6940_v2  ;;  %v1228_v22 = vand.u32 4294901760, %v7157_v17 }
  0x23   : > { %6273 = vmatprep.subr.mxu1 %v6940_v2  ;;  %6255 = vmatmul.mubr.f32.vlgmr.msra.gmra.mxu0 %v244_v21 }
  0x24   : > { %6274 = vmatpush3.msra.mxu1 %v205_v4  ;;  %6265 = vmatpush3.msra.mxu0 %v280_v6 }
  0x25   : > { %6276 = vmatmul.mubr.f32.vlgmr.msra.gmra.mxu1 %v242_v19  ;;  %6268 = vmatprep.mubr.msk.f32.mxu0 %vm6941_vm0, %v6940_v2  ;;  %v152_v19 = vld [vmem:[%s7876_s1 + $0x60] sm:$0xff] }
  0x26   : > { %6266 = vmatprep.subr.mxu0 %v6940_v2  ;;  %6285 = vmatprep.subr.mxu1 %v6940_v2 }
  0x27   : > { %6267 = vmatpush3.msra.mxu0 %v287_v7  ;;  %6286 = vmatpush3.msra.mxu1 %v202_v3  ;;  %v7120_v3 = vand.u32 4294901760, %v156_v0 }
  0x28   : > { %6278 = vmatprep.subr.mxu0 %v6940_v2  ;;  %6269 = vmatmul.mubr.f32.vlgmr.msra.gmra.mxu0 %v241_v18  ;;  %v7160_v18 = vand.u32 4294901760, %v153_v13 }
  0x29   : > { %6279 = vmatpush3.msra.mxu0 %v281_v9  ;;  %6287 = vmatprep.subr.mxu1 %v6940_v2  ;;  %v7129_v6 = vsub.f32 %v156_v0, %v7120_v3  ;;  %v1208_v9 = vsub.f32 %v7118_v1, %v1207_v5 }
  0x2a   : > { %6280 = vmatprep.subr.mxu0 %v6940_v2  ;;  %6282 = vmatprep.mubr.msk.f32.mxu0 %vm6941_vm0, %v6940_v2  ;;  %v7174_v24 = vsub.f32 %v153_v13, %v7160_v18 }
  0x2b   : > { %6281 = vmatpush3.msra.mxu0 %v288_v10  ;;  %6288 = vmatpush3.msra.mxu1 %v205_v4  ;;  %v155_v4 = vld [vmem:[%s7876_s1 + $0x78] sm:$0xff]  ;;  %v1214_v10 = vand.u32 4294901760, %v7129_v6  ;;  %v1209_v14 = vand.u32 4294901760, %v1208_v9 }
  0x2c   : > { %6289 = vmatprep.mubr.msk.f32.mxu1 %vm6941_vm0, %v6940_v2  ;;  %6283 = vmatmul.mubr.f32.vlgmr.msra.gmra.mxu0 %v240_v15  ;;  %v7131_v7 = vand.u32 4294901760, %v155_v4 }
  0x2d   : > { %6290 = vmatmul.mubr.f32.vlgmr.msra.gmra.mxu1 %v240_v15  ;;  %6299 = vmatprep.subr.mxu1 %v6940_v2  ;;  %v1215_v15 = vsub.f32 %v7129_v6, %v1214_v10 }
  0x2e   : > { %6303 = vmatprep.mubr.msk.f32.mxu1 %vm6941_vm0, %v6940_v2  ;;  %6292 = vmatprep.subr.mxu0 %v6940_v2 }
  0x2f   : > { %6296 = vmatprep.mubr.msk.f32.mxu0 %vm6941_vm0, %v6940_v2  ;;  %6293 = vmatpush3.msra.mxu0 %v671_v23  ;;  %v1216_v20 = vand.u32 4294901760, %v1215_v15 }
  0x30   : > { %6294 = vmatprep.subr.mxu0 %v6940_v2  ;;  %6300 = vmatpush3.msra.mxu1 %v752_v31  ;;  %v150_v31 = vld [vmem:[%s7876_s1 + $0x50] sm:$0xff] }
  0x31   : > { %6295 = vmatpush3.msra.mxu0 %v674_v26  ;;  %6301 = vmatprep.subr.mxu1 %v6940_v2 }
  0x32   : > { %6306 = vmatprep.subr.mxu0 %v6940_v2  ;;  %6302 = vmatpush3.msra.mxu1 %v759_v33 }
  0x33   : > { %6313 = vmatprep.subr.mxu1 %v6940_v2 }
  0x92   : > { %v635_v51 = vpop.permute.xlu0 %634 }
  0xe1   : > { %v327_v34 = vpop.f32.mrf.mxu1 }
  0xe3   : > { %v6263_v36 = vpop.f32.mrf.mxu1  ;;  %v246_v37 = vpop.f32.mrf.mxu0 }
  0xe4   : > { %v247_v39 = vadd.f32 %v6003_v35, %v246_v37  ;;  %v7199_v35 = vand.u32 4294901760, %v150_v31 }
  0xe5   : > { %v478_v38 = vpop.f32.mrf.mxu1  ;;  %v6256_v40 = vpop.f32.mrf.mxu0 }
  0xe6   : > { %v328_v42 = vadd.f32 %v327_v34, %v247_v39  ;;  %v7212_v39 = vsub.f32 %v150_v31, %v7199_v35 }
  0xe7   : > { %v6277_v41 = vpop.f32.mrf.mxu1 }
  0xe8   : > { %v403_v43 = vpop.f32.mrf.mxu0 }
  0xe9   : > { %v404_v44 = vadd.f32 %v403_v43, %v328_v42  ;;  %v1256_v43 = vand.u32 4294901760, %v7212_v39 }
  0xea   : > { %v6270_v45 = vpop.f32.mrf.mxu0 }
  0xeb   : > { %v479_v46 = vadd.f32 %v478_v38, %v404_v44  ;;  %v1257_v45 = vsub.f32 %v7212_v39, %v1256_v43 }
  0xec   : > { %v555_v47 = vpop.f32.mrf.mxu0 }
  0xed   : > { %v556_v48 = vadd.f32 %v555_v47, %v479_v46  ;;  %v628_v49 = vpop.f32.mrf.mxu1  ;;  %v1258_v46 = vand.u32 4294901760, %v1257_v45 }
  0xee   : > { %v6284_v50 = vpop.f32.mrf.mxu0 }
  0xef   : > { %v629_v52 = vadd.f32 %v628_v49, %v556_v48  ;;  %v6291_v53 = vpop.f32.mrf.mxu1 }
  0xf1   : > { %v637_v54 = vmul.f32 %v635_v51, %v629_v52 }
  0xf3   : > { %v638_v55 = vadd.f32 %v637_v54, %v7038_v11  ;;  %v7143_v11 = vsub.f32 %v155_v4, %v7131_v7 }
  0xf5   : > { %v640_v56 = vsel %vm169_vm1, %v638_v55, 0  ;;  %v1221_v16 = vand.u32 4294901760, %v7143_v11 }
  0xf6   : > { %v709_v57 = vand.u32 4294901760, %v640_v56 }
  0xf7   : > { %v1222_v21 = vsub.f32 %v7143_v11, %v1221_v16 }
  0xf8   : > { %v710_v58 = vsub.f32 %v640_v56, %v709_v57  ;;  %6304 = vmatmul.mubr.f32.vlgmr.msra.gmra.mxu1 %v709_v57 }
  0xf9   : > { %6314 = vmatpush3.msra.mxu1 %v671_v23  ;;  %6317 = vmatprep.mubr.msk.f32.mxu1 %vm6941_vm0, %v6940_v2 }
  0xfa   : > { %6315 = vmatprep.subr.mxu1 %v6940_v2  ;;  %v711_v59 = vand.u32 4294901760, %v710_v58 }
  0xfb   : > { %6316 = vmatpush3.msra.mxu1 %v674_v26 }
  0xfc   : > { %6318 = vmatmul.mubr.f32.vlgmr.msra.gmra.mxu1 %v711_v59  ;;  %6327 = vmatprep.subr.mxu1 %v6940_v2  ;;  %v712_v60 = vsub.f32 %v710_v58, %v711_v59 }
  0xfd   : > { %6328 = vmatpush3.msra.mxu1 %v671_v23  ;;  %6331 = vmatprep.mubr.msk.f32.mxu1 %vm6941_vm0, %v6940_v2  ;;  %v7170_v23 = vand.u32 4294901760, %v152_v19 }
  0xfe   : > { %6329 = vmatprep.subr.mxu1 %v6940_v2  ;;  %v713_v61 = vand.u32 4294901760, %v712_v60 }
  0xff   : > { %6330 = vmatpush3.msra.mxu1 %v674_v26  ;;  %v1223_v26 = vand.u32 4294901760, %v1222_v21 }
 0x100   : > { %6297 = vmatmul.mubr.f32.vlgmr.msra.gmra.mxu0 %v713_v61  ;;  %6332 = vmatmul.mubr.f32.vlgmr.msra.gmra.mxu1 %v709_v57 }
 0x101   : > { %6307 = vmatpush3.msra.mxu0 %v7070_v25  ;;  %6310 = vmatprep.mubr.msk.f32.mxu0 %vm6941_vm0, %v6940_v2  ;;  %v151_v25 = vld [vmem:[%s7876_s1 + $0x58] sm:$0xff] }
 0x102   : > { %6308 = vmatprep.subr.mxu0 %v6940_v2  ;;  %6353 = vmatprep.subr.mxu1 %v6940_v2  ;;  %v7186_v29 = vand.u32 4294901760, %v151_v25 }
 0x103   : > { %6309 = vmatpush3.msra.mxu0 %v7074_v28  ;;  %6369 = vmatprep.mubr.msk.f32.mxu1 %vm6941_vm0, %v6940_v2  ;;  %v7184_v28 = vsub.f32 %v152_v19, %v7170_v23 }
 0x104   : > { %6320 = vmatprep.subr.mxu0 %v6940_v2  ;;  %6311 = vmatmul.mubr.f32.vlgmr.msra.gmra.mxu0 %v710_v58  ;;  %v7197_v34 = vsub.f32 %v151_v25, %v7186_v29 }
 0x105   : > { %6321 = vmatpush3.msra.mxu0 %v750_v27  ;;  %6324 = vmatprep.mubr.msk.f32.mxu0 %vm6941_vm0, %v6940_v2  ;;  %v1229_v27 = vsub.f32 %v7157_v17, %v1228_v22  ;;  %v1242_v33 = vand.u32 4294901760, %v7184_v28 }
 0x106   : > { %6322 = vmatprep.subr.mxu0 %v6940_v2  ;;  %6354 = vmatpush3.msra.mxu1 %v1209_v14  ;;  %v1249_v38 = vand.u32 4294901760, %v7197_v34 }
 0x107   : > { %6323 = vmatpush3.msra.mxu0 %v757_v30  ;;  %6355 = vmatprep.subr.mxu1 %v6940_v2  ;;  %v1235_v30 = vand.u32 4294901760, %v7174_v24  ;;  %v1230_v32 = vand.u32 4294901760, %v1229_v27  ;;  %v1243_v37 = vsub.f32 %v7184_v28, %v1242_v33 }
 0x108   : > { %6325 = vmatmul.mubr.f32.vlgmr.msra.gmra.mxu0 %v709_v57  ;;  %6334 = vmatprep.subr.mxu0 %v6940_v2  ;;  %v1250_v42 = vsub.f32 %v7197_v34, %v1249_v38 }
 0x109   : > { %6350 = vmatprep.mubr.msk.f32.mxu0 %vm6941_vm0, %v6940_v2  ;;  %6335 = vmatpush3.msra.mxu0 %v7112_v63  ;;  %v1236_v36 = vsub.f32 %v7174_v24, %v1235_v30  ;;  %v1244_v41 = vand.u32 4294901760, %v1243_v37 }
 0x10a   : > { %6336 = vmatprep.subr.mxu0 %v6940_v2  ;;  %6356 = vmatpush3.msra.mxu1 %v1216_v20  ;;  %v1251_v44 = vand.u32 4294901760, %v1250_v42 }
 0x10b   : > { %6337 = vmatpush3.msra.mxu0 %v7120_v3  ;;  %6357 = vmatprep.subr.mxu1 %v6940_v2  ;;  %v1237_v40 = vand.u32 4294901760, %v1236_v36 }
 0x10c   : > { %6338 = vmatprep.subr.mxu0 %v6940_v2  ;;  %6358 = vmatpush3.msra.mxu1 %v1223_v26 }
 0x10d   : > { %6339 = vmatpush3.msra.mxu0 %v7131_v7  ;;  %6359 = vmatprep.subr.mxu1 %v6940_v2 }
 0x10e   : > { %6340 = vmatprep.subr.mxu0 %v6940_v2  ;;  %6360 = vmatpush3.msra.mxu1 %v1230_v32 }
 0x10f   : > { %6341 = vmatpush3.msra.mxu0 %v7145_v12  ;;  %6361 = vmatprep.subr.mxu1 %v6940_v2 }
 0x110   : > { %6342 = vmatprep.subr.mxu0 %v6940_v2  ;;  %6362 = vmatpush3.msra.mxu1 %v1237_v40 }
 0x111   : > { %6343 = vmatpush3.msra.mxu0 %v7160_v18  ;;  %6363 = vmatprep.subr.mxu1 %v6940_v2 }
 0x112   : > { %6344 = vmatprep.subr.mxu0 %v6940_v2  ;;  %6364 = vmatpush3.msra.mxu1 %v1244_v41 }
 0x113   : > { %6345 = vmatpush3.msra.mxu0 %v7170_v23  ;;  %6365 = vmatprep.subr.mxu1 %v6940_v2 }
 0x114   : > { %6346 = vmatprep.subr.mxu0 %v6940_v2  ;;  %6366 = vmatpush3.msra.mxu1 %v1251_v44 }
 0x115   : > { %6347 = vmatpush3.msra.mxu0 %v7186_v29  ;;  %6367 = vmatprep.subr.mxu1 %v6940_v2 }
 0x116   : > { %6348 = vmatprep.subr.mxu0 %v6940_v2  ;;  %6368 = vmatpush3.msra.mxu1 %v1258_v46 }
 0x117   : > { %6349 = vmatpush3.msra.mxu0 %v7199_v35  ;;  %6391 = vmatprep.subr.mxu1 %v6940_v2 }
 0x118   : > { %6372 = vmatprep.subr.mxu0 %v6940_v2 }
 0x1b8   : > { %v796_v47 = vpop.f32.mrf.mxu1 }
 0x1ba   : > { %v6305_v48 = vpop.f32.mrf.mxu1 }
 0x1bc   : > { %v947_v49 = vpop.f32.mrf.mxu1 }
 0x1be   : > { %v6319_v50 = vpop.f32.mrf.mxu1 }
 0x1c0   : > { %v715_v51 = vpop.f32.mrf.mxu0  ;;  %v1097_v52 = vpop.f32.mrf.mxu1 }
 0x1c1   : > { %v797_v55 = vadd.f32 %v796_v47, %v715_v51 }
 0x1c2   : > { %v6298_v53 = vpop.f32.mrf.mxu0  ;;  %v6333_v54 = vpop.f32.mrf.mxu1 }
 0x1c4   : > { %v872_v56 = vpop.f32.mrf.mxu0 }
 0x1c5   : > { %v873_v57 = vadd.f32 %v872_v56, %v797_v55 }
 0x1c6   : > { %v6312_v58 = vpop.f32.mrf.mxu0 }
 0x1c7   : > { %v948_v59 = vadd.f32 %v947_v49, %v873_v57 }
 0x1c8   : > { %v1024_v60 = vpop.f32.mrf.mxu0 }
 0x1c9   : > { %v1025_v61 = vadd.f32 %v1024_v60, %v948_v59  ;;  %v2098_v60 = vlaneseq }
 0x1ca   : > { %v6326_v62 = vpop.f32.mrf.mxu0 }
 0x1cb   : > { %v7229_v0 = vadd.f32 %v1097_v52, %v1025_v61  ;;  %v6944_v52 = vmov 1   ;;  %v2099_v61 = vshrl.u32 %v2098_v60, 7 }
 0x1cd   : > { %v1103_v4 = vsel %vm1101_vm2, %v7229_v0, 0  ;;  %v1645_v19 = vsel %vm169_vm1, %v7229_v0, 0  ;;  %v7381_v62 = vsub.s32 0, %v2099_v61 }
 0x1ce   : > { %v7233_v8 = vand.u32 4294901760, %v1103_v4  ;;  %v7268_v20 = vand.u32 4294901760, %v1645_v19 }
 0x1d0   : > { %v1179_v9 = vsub.f32 %v1103_v4, %v7233_v8  ;;  %6370 = vmatmul.mubr.f32.vlgmr.msra.gmra.mxu1 %v7233_v8  ;;  %v7284_v21 = vsub.f32 %v1645_v19, %v7268_v20 }
 0x1d1   : > { %6392 = vmatpush3.msra.mxu1 %v7112_v63  ;;  %6407 = vmatprep.mubr.msk.f32.mxu1 %vm6941_vm0, %v6940_v2 }
 0x1d2   : > { %6393 = vmatprep.subr.mxu1 %v6940_v2  ;;  %v1180_v13 = vand.u32 4294901760, %v1179_v9 }
 0x1d3   : > { %6394 = vmatpush3.msra.mxu1 %v7120_v3 }
 0x1d4   : > { %6395 = vmatprep.subr.mxu1 %v6940_v2  ;;  %v1181_v14 = vsub.f32 %v1179_v9, %v1180_v13 }
 0x1d5   : > { %6396 = vmatpush3.msra.mxu1 %v7131_v7 }
 0x1d6   : > { %6397 = vmatprep.subr.mxu1 %v6940_v2  ;;  %v1182_v15 = vand.u32 4294901760, %v1181_v14  ;;  %v7387_v14 = vld [vmem:[%s7876_s1 + $0xa0] sm:$0xff] }
 0x1d7   : > { %6398 = vmatpush3.msra.mxu1 %v7145_v12 }
 0x1d8   : > { %6399 = vmatprep.subr.mxu1 %v6940_v2  ;;  %6351 = vmatmul.mubr.f32.vlgmr.msra.gmra.mxu0 %v1182_v15 }
 0x1d9   : > { %6373 = vmatpush3.msra.mxu0 %v7118_v1  ;;  %6400 = vmatpush3.msra.mxu1 %v7160_v18 }
 0x1da   : > { %6374 = vmatprep.subr.mxu0 %v6940_v2  ;;  %6401 = vmatprep.subr.mxu1 %v6940_v2 }
 0x1db   : > { %6375 = vmatpush3.msra.mxu0 %v7129_v6  ;;  %6402 = vmatpush3.msra.mxu1 %v7170_v23 }
 0x1dc   : > { %6376 = vmatprep.subr.mxu0 %v6940_v2  ;;  %6403 = vmatprep.subr.mxu1 %v6940_v2 }
 0x1dd   : > { %6377 = vmatpush3.msra.mxu0 %v7143_v11  ;;  %6404 = vmatpush3.msra.mxu1 %v7186_v29 }
 0x1de   : > { %6378 = vmatprep.subr.mxu0 %v6940_v2  ;;  %6405 = vmatprep.subr.mxu1 %v6940_v2 }
 0x1df   : > { %6379 = vmatpush3.msra.mxu0 %v7157_v17  ;;  %6406 = vmatpush3.msra.mxu1 %v7199_v35 }
 0x1e0   : > { %6380 = vmatprep.subr.mxu0 %v6940_v2  ;;  %6408 = vmatmul.mubr.f32.vlgmr.msra.gmra.mxu1 %v1180_v13 }
 0x1e1   : > { %6429 = vmatprep.subr.mxu1 %v6940_v2  ;;  %6381 = vmatpush3.msra.mxu0 %v7174_v24 }
 0x1e2   : > { %6430 = vmatpush3.msra.mxu1 %v7112_v63  ;;  %6382 = vmatprep.subr.mxu0 %v6940_v2  ;;  %v7279_v63 = vld [vmem:[%s7876_s1 + $0xc0] sm:$0x1] }
 0x1e3   : > { %6431 = vmatprep.subr.mxu1 %v6940_v2  ;;  %6383 = vmatpush3.msra.mxu0 %v7184_v28 }
 0x1e4   : > { %6432 = vmatpush3.msra.mxu1 %v7120_v3  ;;  %6384 = vmatprep.subr.mxu0 %v6940_v2  ;;  %v1643_v3 = vsel %vm169_vm1, %v7279_v63, 0 }
 0x1e5   : > { %6433 = vmatprep.subr.mxu1 %v6940_v2  ;;  %6385 = vmatpush3.msra.mxu0 %v7197_v34  ;;  %v1713_v25 = vand.u32 4294901760, %v1643_v3 }
 0x1e6   : > { %6434 = vmatpush3.msra.mxu1 %v7131_v7  ;;  %6386 = vmatprep.subr.mxu0 %v6940_v2  ;;  %v1756_v7 = vand.u32 4294901760, %v7284_v21 }
 0x1e7   : > { %6435 = vmatprep.subr.mxu1 %v6940_v2  ;;  %6387 = vmatpush3.msra.mxu0 %v7212_v39 }
 0x1e8   : > { %6388 = vmatprep.mubr.msk.f32.mxu0 %vm6941_vm0, %v6940_v2  ;;  %6436 = vmatpush3.msra.mxu1 %v7145_v12  ;;  %v1757_v1 = vsub.f32 %v7284_v21, %v1756_v7  ;;  %v7312_v12 = vand.u32 4294901760, %v7229_v0 }
 0x1e9   : > { %6389 = vmatmul.mubr.f32.vlgmr.msra.gmra.mxu0 %v1179_v9  ;;  %6410 = vmatprep.subr.mxu0 %v6940_v2 }
 0x1ea   : > { %6437 = vmatprep.subr.mxu1 %v6940_v2  ;;  %6411 = vmatpush3.msra.mxu0 %v1207_v5  ;;  %v1714_v5 = vsub.f32 %v1643_v3, %v1713_v25  ;;  %v1758_v6 = vand.u32 4294901760, %v1757_v1  ;;  %v7327_v11 = vsub.f32 %v7229_v0, %v7312_v12 }
 0x1eb   : > { %6438 = vmatpush3.msra.mxu1 %v7160_v18  ;;  %6412 = vmatprep.subr.mxu0 %v6940_v2 }
 0x1ec   : > { %6439 = vmatprep.subr.mxu1 %v6940_v2  ;;  %6413 = vmatpush3.msra.mxu0 %v1214_v10  ;;  %v1715_v10 = vand.u32 4294901760, %v1714_v5  ;;  %v2231_v17 = vand.u32 4294901760, %v7327_v11 }
 0x1ed   : > { %6440 = vmatpush3.msra.mxu1 %v7170_v23  ;;  %6414 = vmatprep.subr.mxu0 %v6940_v2 }
 0x1ee   : > { %6441 = vmatprep.subr.mxu1 %v6940_v2  ;;  %6415 = vmatpush3.msra.mxu0 %v1221_v16  ;;  %v1716_v16 = vsub.f32 %v1714_v5, %v1715_v10 }
 0x1ef   : > { %6442 = vmatpush3.msra.mxu1 %v7186_v29  ;;  %6416 = vmatprep.subr.mxu0 %v6940_v2 }
 0x1f0   : > { %6443 = vmatprep.subr.mxu1 %v6940_v2  ;;  %6417 = vmatpush3.msra.mxu0 %v1228_v22  ;;  %v1717_v18 = vand.u32 4294901760, %v1716_v16  ;;  %v2232_v22 = vsub.f32 %v7327_v11, %v2231_v17 }
 0x1f1   : > { %6444 = vmatpush3.msra.mxu1 %v7199_v35  ;;  %6445 = vmatprep.mubr.msk.f32.mxu1 %vm6941_vm0, %v6940_v2 }
 0x1f2   : > { %6418 = vmatprep.subr.mxu0 %v6940_v2  ;;  %6446 = vmatmul.mubr.f32.vlgmr.msra.gmra.mxu1 %v7233_v8  ;;  %v2233_v23 = vand.u32 4294901760, %v2232_v22 }
 0x1f3   : > { %6453 = vmatprep.subr.mxu1 %v6940_v2  ;;  %6419 = vmatpush3.msra.mxu0 %v1235_v30 }
 0x1f4   : > { %6454 = vmatpush3.xpose.msra.mxu1 %v1758_v6  ;;  %6420 = vmatprep.subr.mxu0 %v6940_v2 }
 0x1f5   : > { %6421 = vmatpush3.msra.mxu0 %v1242_v33  ;;  %6455 = vmatprep.mubr.msk.f32.mxu1 %vm6941_vm0, %v6940_v2 }
 0x1f6   : > { %6422 = vmatprep.subr.mxu0 %v6940_v2  ;;  %6463 = vmatprep.subr.mxu1 %v6940_v2 }
 0x1f7   : > { %6423 = vmatpush3.msra.mxu0 %v1249_v38  ;;  %6456 = vmatmul.mubr.f32.vlgmr.msra.gmra.mxu1 %v1713_v25 }
 0x1f8   : > { %6464 = vmatpush3.xpose.msra.mxu1 %v7268_v20  ;;  %6424 = vmatprep.subr.mxu0 %v6940_v2 }
 0x1f9   : > { %6425 = vmatpush3.msra.mxu0 %v1256_v43  ;;  %6426 = vmatprep.mubr.msk.f32.mxu0 %vm6941_vm0, %v6940_v2 }
 0x1fa   : > { %6427 = vmatmul.mubr.f32.vlgmr.msra.gmra.mxu0 %v7233_v8  ;;  %6448 = vmatprep.subr.mxu0 %v6940_v2 }
 0x1fb   : > { %6465 = vmatprep.mubr.msk.f32.mxu1 %vm6941_vm0, %v6940_v2  ;;  %6473 = vmatprep.subr.mxu1 %v6940_v2 }
 0x1fc   : > { %6449 = vmatpush3.xpose.msra.mxu0 %v7268_v20  ;;  %6466 = vmatmul.mubr.f32.vlgmr.msra.gmra.mxu1 %v1715_v10 }
 0x1fd   : > { %6474 = vmatpush3.xpose.msra.mxu1 %v7268_v20  ;;  %6450 = vmatprep.mubr.msk.f32.mxu0 %vm6941_vm0, %v6940_v2 }
 0x1fe   : > { %6458 = vmatprep.subr.mxu0 %v6940_v2  ;;  %6475 = vmatprep.mubr.msk.f32.mxu1 %vm6941_vm0, %v6940_v2 }
 0x1ff   : > { %6483 = vmatprep.subr.mxu1 %v6940_v2  ;;  %6451 = vmatmul.mubr.f32.vlgmr.msra.gmra.mxu0 %v1717_v18 }
 0x200   : > { %6459 = vmatpush3.xpose.msra.mxu0 %v7284_v21  ;;  %6476 = vmatmul.mubr.f32.vlgmr.msra.gmra.mxu1 %v1713_v25 }
 0x201   : > { %6484 = vmatpush3.msra.mxu1 %v2233_v23  ;;  %6460 = vmatprep.mubr.msk.f32.mxu0 %vm6941_vm0, %v6940_v2 }
 0x202   : > { %6468 = vmatprep.subr.mxu0 %v6940_v2  ;;  %6485 = vmatprep.mubr.msk.f32.mxu1 %vm6941_vm0, %v6940_v2 }
 0x203   : > { %6461 = vmatmul.mubr.f32.vlgmr.msra.gmra.mxu0 %v1714_v5  ;;  %6493 = vmatprep.subr.mxu1 %v6940_v2 }
 0x204   : > { %6469 = vmatpush3.xpose.msra.mxu0 %v1756_v7  ;;  %6470 = vmatprep.mubr.msk.f32.mxu0 %vm6941_vm0, %v6940_v2 }
 0x205   : > { %6478 = vmatprep.subr.mxu0 %v6940_v2 }
 0x207   : > { %6471 = vmatmul.mubr.f32.vlgmr.msra.gmra.mxu0 %v1713_v25 }
 0x208   : > { %6479 = vmatpush3.msra.mxu0 %v7312_v12  ;;  %6480 = vmatprep.mubr.msk.f32.mxu0 %vm6941_vm0, %v6940_v2 }
 0x209   : > { %6488 = vmatprep.subr.mxu0 %v6940_v2 }
 0x290   : > { %v1295_v24 = vpop.f32.mrf.mxu1 }
 0x292   : > { %v6371_v26 = vpop.f32.mrf.mxu1 }
 0x298   : > { %v1184_v27 = vpop.f32.mrf.mxu0 }
 0x299   : > { %v1296_v34 = vadd.f32 %v1295_v24, %v1184_v27 }
 0x29a   : > { %v6352_v28 = vpop.f32.mrf.mxu0 }
 0x2a0   : > { %v1464_v29 = vpop.f32.mrf.mxu1 }
 0x2a2   : > { %v6409_v30 = vpop.f32.mrf.mxu1 }
 0x2a9   : > { %v1383_v31 = vpop.f32.mrf.mxu0 }
 0x2aa   : > { %v1384_v36 = vadd.f32 %v1383_v31, %v1296_v34 }
 0x2ab   : > { %v6390_v32 = vpop.f32.mrf.mxu0 }
 0x2ac   : > { %v1465_v38 = vadd.f32 %v1464_v29, %v1384_v36 }
 0x2b2   : > { %v1638_v33 = vpop.f32.mrf.mxu1 }
 0x2b4   : > { %v6447_v35 = vpop.f32.mrf.mxu1 }
 0x2b7   : > { %v1795_v37 = vpop.f32.mrf.mxu1 }
 0x2b9   : > { %v6457_v39 = vpop.f32.mrf.mxu1 }
 0x2ba   : > { %v1559_v40 = vpop.f32.mrf.mxu0 }
 0x2bb   : > { %v1560_v41 = vadd.f32 %v1559_v40, %v1465_v38 }
 0x2bc   : > { %v6428_v42 = vpop.f32.mrf.mxu0  ;;  %v1943_v43 = vpop.f32.mrf.mxu1 }
 0x2bd   : > { %v7375_v44 = vadd.f32 %v1638_v33, %v1560_v41 }
 0x2be   : > { %v6467_v45 = vpop.f32.mrf.mxu1 }
 0x2bf   : > { %2095 = vperm.xlu0 %6853, %v7375_v44   ;;  %v1719_v46 = vpop.f32.mrf.mxu0 }
 0x2c0   : > { %v1796_v47 = vadd.f32 %v1795_v37, %v1719_v46  ;;  %v2089_v48 = vpop.f32.mrf.mxu1 }
 0x2c1   : > { %v6452_v49 = vpop.f32.mrf.mxu0 }
 0x2c2   : > { %v6477_v50 = vpop.f32.mrf.mxu1 }
 0x2c3   : > { %2571 = vrot.lane.b32.xlu0 %v7229_v0, %s6943_s14  ;;  %v1869_v51 = vpop.f32.mrf.mxu0 }
 0x2c4   : > { %6854 = vset.pattern.permute.xlu0 %v6944_v52  ;;  %v1870_v53 = vadd.f32 %v1869_v51, %v1796_v47 }
 0x2c5   : > { %v6462_v54 = vpop.f32.mrf.mxu0 }
 0x2c6   : > { %v1944_v55 = vadd.f32 %v1943_v43, %v1870_v53  ;;  %v6945_v43 = vmov 2  }
 0x2c7   : > { %3024 = vperm.xlu0 %6854, %v7375_v44   ;;  %v2017_v56 = vpop.f32.mrf.mxu0 }
 0x2c8   : > { %v2018_v57 = vadd.f32 %v2017_v56, %v1944_v55 }
 0x2c9   : > { %v6472_v58 = vpop.f32.mrf.mxu0 }
 0x2ca   : > { %v2090_v59 = vadd.f32 %v2089_v48, %v2018_v57 }
 0x2cb   : > { %6855 = vset.pattern.permute.xlu0 %v6945_v43 }
 0x2cc   : > { %v2101_v4 = vrot.slane %v2090_v59, %v7381_v62 }
 0x33a   : > { %v2096_v8 = vpop.permute.xlu0 %2095 }
 0x33b   : > { %v2102_v9 = vadd.f32 %v2101_v4, %v2096_v8 }
 0x33d   : > { %v2104_v13 = vmul.f32 0.2, %v2102_v9  ;;  %vm2103_vm3 = vcmp.gt.f32.partialorder %v2102_v9, 0.0 }
 0x33e   : > { %v2572_v6 = vpop.permute.xlu0 %2571 }
 0x33f   : > { %v2105_v15 = vsel %vm2103_vm3, %v2102_v9, %v2104_v13  ;;  %v2575_v10 = vsel %vm169_vm1, %v2572_v6, 0  ;;  %v7404_v33 = vand.u32 4294901760, %v2572_v6 }
 0x340   : > { %v2106_v19 = vadd.f32 %v2105_v15, %v7387_v14  ;;  %v2608_v16 = vand.u32 4294901760, %v2575_v10 }
 0x341   : > { %v7412_v38 = vsub.f32 %v2572_v6, %v7404_v33 }
 0x342   : > { %v2108_v20 = vsel %vm2107_vm4, %v2106_v19, -inf  ;;  %v7395_v22 = vsub.f32 %v2575_v10, %v2608_v16 }
 0x343   : > { %2109 = vmax.xlane.f32.xlu1 %v2108_v20 }
 0x344   : > { %v2686_v28 = vand.u32 4294901760, %v7395_v22 }
 0x346   : > { %v2687_v34 = vsub.f32 %v7395_v22, %v2686_v28 }
 0x348   : > { %v2688_v39 = vand.u32 4294901760, %v2687_v34 }
 0x3cc   : > { %v2110_v21 = vpop.xlane.xlu1 %2109 }
 0x3cd   : > { %v2111_v3 = vsub.f32 %v2106_v19, %v2110_v21 }
 0x3cf   : > { %v2112_v7 = vmul.f32 1.442695, %v2111_v3 }
 0x3d1   : > { %6858 = vpow2.f32 %v2112_v7 }
 0x3de   : > { %v6859_v25 = vpop.eup %6858 }
 0x3df   : > { %v2114_v1 = vsel %vm2107_vm4, %v6859_v25, 0.0 }
 0x3e0   : > { %2115 = vadd.xlane.f32.xlu1 %v2114_v1 }
 0x3f1   : > { %2569 = vrot.lane.b32.xlu1 %v7279_v63, %s6943_s14  ;;  %s6952_s14 = smov [#allocation2]  }
 0x3f2   : > { %s6882_s13 = sshll.u32 %s6952_s14, 4  ;;  %s6883_s13 = int_to_ptr.vmem [resolvable:$false] %s6882_s13 }
 0x3f3   : > { %s6884_s16 = scalar_lea.vmem %s6883_s13, 256  ;;  %p6885_p0 = scmp.lt.s32.totalorder %s5939_s3, %s6883_s13 }
 0x3f4   : > { %p6886_p1 = scmp.lt.s32.totalorder %s6884_s16, %s6878_s8 }
 0x3f6   : > { %p6887_p2 = por %p6886_p1, %p6885_p0 }
 0x3f8   : > { %p6888_p3 = pnand %p6887_p2, %p6881_p13 }
 0x469   : > { %v2116_v5 = vpop.xlane.xlu1 %2115 }
 0x46a   : > { %6860 = vrcp.f32 %v2116_v5 }
 0x46d   : > { %v2570_v24 = vpop.permute.xlu1 %2569 }
 0x46e   : > { %v2573_v29 = vsel %vm169_vm1, %v2570_v24, 0 }
 0x46f   : > { %v2643_v32 = vand.u32 4294901760, %v2573_v29 }
 0x471   : > { %v2644_v36 = vsub.f32 %v2573_v29, %v2643_v32 }
 0x473   : > { %v2645_v40 = vand.u32 4294901760, %v2644_v36 }
 0x475   : > { %v2646_v41 = vsub.f32 %v2644_v36, %v2645_v40 }
 0x477   : > { %v6861_v18 = vpop.eup %6860 }
 0x478   : > { %v2118_v23 = vmul.f32 %v6861_v18, %v6859_v25 }
 0x47a   : > { %v2120_v26 = vsel %vm2107_vm4, %v2118_v23, 0  ;;  %v3025_v23 = vpop.permute.xlu0 %3024 }
 0x47b   : > { %v2188_v27 = vand.u32 4294901760, %v2120_v26 }
 0x47d   : > { %v2189_v30 = vsub.f32 %v2120_v26, %v2188_v27  ;;  %6486 = vmatmul.mubr.f32.vlgmr.msra.gmra.mxu1 %v2188_v27 }
 0x47e   : > { %6494 = vmatpush3.msra.mxu1 %v7312_v12  ;;  %6495 = vmatprep.mubr.msk.f32.mxu1 %vm6941_vm0, %v6940_v2 }
 0x47f   : > { %6503 = vmatprep.subr.mxu1 %v6940_v2  ;;  %v2190_v31 = vand.u32 4294901760, %v2189_v30 }
 0x481   : > { %6496 = vmatmul.mubr.f32.vlgmr.msra.gmra.mxu1 %v2190_v31  ;;  %v2191_v35 = vsub.f32 %v2189_v30, %v2190_v31 }
 0x482   : > { %6504 = vmatpush3.msra.mxu1 %v7312_v12  ;;  %6505 = vmatprep.mubr.msk.f32.mxu1 %vm6941_vm0, %v6940_v2  ;;  %v3160_v12 = vand.u32 4294901760, %v7412_v38 }
 0x483   : > { %6513 = vmatprep.subr.mxu1 %v6940_v2  ;;  %v2192_v37 = vand.u32 4294901760, %v2191_v35 }
 0x484   : > { %v3161_v42 = vsub.f32 %v7412_v38, %v3160_v12 }
 0x485   : > { %6481 = vmatmul.mubr.f32.vlgmr.msra.gmra.mxu0 %v2192_v37  ;;  %6506 = vmatmul.mubr.f32.vlgmr.msra.gmra.mxu1 %v2188_v27 }
 0x486   : > { %6489 = vmatpush3.msra.mxu0 %v7327_v11  ;;  %6514 = vmatpush3.xpose.msra.mxu1 %v2688_v39  ;;  %v2647_v11 = vand.u32 4294901760, %v2646_v41 }
 0x487   : > { %6490 = vmatprep.mubr.msk.f32.mxu0 %vm6941_vm0, %v6940_v2  ;;  %6498 = vmatprep.subr.mxu0 %v6940_v2 }
 0x488   : > { %6515 = vmatprep.mubr.msk.f32.mxu1 %vm6941_vm0, %v6940_v2  ;;  %6523 = vmatprep.subr.mxu1 %v6940_v2 }
 0x489   : > { %6491 = vmatmul.mubr.f32.vlgmr.msra.gmra.mxu0 %v2189_v30  ;;  %6516 = vmatmul.mubr.f32.vlgmr.msra.gmra.mxu1 %v2643_v32 }
 0x48a   : > { %6499 = vmatpush3.msra.mxu0 %v2231_v17  ;;  %6524 = vmatpush3.xpose.msra.mxu1 %v2608_v16  ;;  %v3162_v17 = vand.u32 4294901760, %v3161_v42 }
 0x48b   : > { %6500 = vmatprep.mubr.msk.f32.mxu0 %vm6941_vm0, %v6940_v2  ;;  %6508 = vmatprep.subr.mxu0 %v6940_v2 }
 0x48c   : > { %6525 = vmatprep.mubr.msk.f32.mxu1 %vm6941_vm0, %v6940_v2  ;;  %6533 = vmatprep.subr.mxu1 %v6940_v2 }
 0x48d   : > { %6501 = vmatmul.mubr.f32.vlgmr.msra.gmra.mxu0 %v2188_v27  ;;  %6526 = vmatmul.mubr.f32.vlgmr.msra.gmra.mxu1 %v2645_v40 }
 0x48e   : > { %6509 = vmatpush3.xpose.msra.mxu0 %v2608_v16  ;;  %6534 = vmatpush3.xpose.msra.mxu1 %v2608_v16 }
 0x48f   : > { %6510 = vmatprep.mubr.msk.f32.mxu0 %vm6941_vm0, %v6940_v2  ;;  %6518 = vmatprep.subr.mxu0 %v6940_v2 }
 0x490   : > { %6535 = vmatprep.mubr.msk.f32.mxu1 %vm6941_vm0, %v6940_v2  ;;  %6543 = vmatprep.subr.mxu1 %v6940_v2 }
 0x491   : > { %6511 = vmatmul.mubr.f32.vlgmr.msra.gmra.mxu0 %v2647_v11  ;;  %6536 = vmatmul.mubr.f32.vlgmr.msra.gmra.mxu1 %v2643_v32 }
 0x492   : > { %6519 = vmatpush3.xpose.msra.mxu0 %v7395_v22  ;;  %6544 = vmatpush3.msra.mxu1 %v3162_v17 }
 0x493   : > { %6520 = vmatprep.mubr.msk.f32.mxu0 %vm6941_vm0, %v6940_v2  ;;  %6528 = vmatprep.subr.mxu0 %v6940_v2 }
 0x494   : > { %6545 = vmatprep.mubr.msk.f32.mxu1 %vm6941_vm0, %v6940_v2  ;;  %6553 = vmatprep.subr.mxu1 %v6940_v2 }
 0x495   : > { %6521 = vmatmul.mubr.f32.vlgmr.msra.gmra.mxu0 %v2644_v36 }
 0x496   : > { %6529 = vmatpush3.xpose.msra.mxu0 %v2686_v28  ;;  %6530 = vmatprep.mubr.msk.f32.mxu0 %vm6941_vm0, %v6940_v2 }
 0x497   : > { %6538 = vmatprep.subr.mxu0 %v6940_v2 }
 0x499   : > { %6531 = vmatmul.mubr.f32.vlgmr.msra.gmra.mxu0 %v2643_v32 }
 0x49a   : > { %6539 = vmatpush3.msra.mxu0 %v7404_v33  ;;  %6540 = vmatprep.mubr.msk.f32.mxu0 %vm6941_vm0, %v6940_v2 }
 0x49b   : > { %6548 = vmatprep.subr.mxu0 %v6940_v2 }
 0x53d   : > { %v2270_v45 = vpop.f32.mrf.mxu1 }
 0x53f   : > { %v6487_v46 = vpop.f32.mrf.mxu1 }
 0x541   : > { %v2418_v47 = vpop.f32.mrf.mxu1 }
 0x543   : > { %v6497_v48 = vpop.f32.mrf.mxu1 }
 0x545   : > { %v2194_v49 = vpop.f32.mrf.mxu0  ;;  %v2564_v50 = vpop.f32.mrf.mxu1 }
 0x546   : > { %v2271_v53 = vadd.f32 %v2270_v45, %v2194_v49 }
 0x547   : > { %v6482_v51 = vpop.f32.mrf.mxu0  ;;  %v6507_v52 = vpop.f32.mrf.mxu1 }
 0x549   : > { %v2344_v54 = vpop.f32.mrf.mxu0  ;;  %v2725_v55 = vpop.f32.mrf.mxu1 }
 0x54a   : > { %v2345_v56 = vadd.f32 %v2344_v54, %v2271_v53 }
 0x54b   : > { %v6492_v57 = vpop.f32.mrf.mxu0  ;;  %v6517_v58 = vpop.f32.mrf.mxu1 }
 0x54c   : > { %v2419_v59 = vadd.f32 %v2418_v47, %v2345_v56 }
 0x54d   : > { %v2492_v60 = vpop.f32.mrf.mxu0  ;;  %v2873_v61 = vpop.f32.mrf.mxu1 }
 0x54e   : > { %v2493_v4 = vadd.f32 %v2492_v60, %v2419_v59 }
 0x54f   : > { %v6502_v8 = vpop.f32.mrf.mxu0  ;;  %v6527_v9 = vpop.f32.mrf.mxu1 }
 0x550   : > { %v2565_v13 = vadd.f32 %v2564_v50, %v2493_v4 }
 0x551   : > { %v2649_v15 = vpop.f32.mrf.mxu0  ;;  %v3019_v19 = vpop.f32.mrf.mxu1 }
 0x552   : > { %2568 = vst.msk [vmem:[%s7456_s23] sm:$0xff] %vm169_vm1, %v2565_v13  ;;  %v2726_v3 = vadd.f32 %v2725_v55, %v2649_v15 }
 0x553   : > { %v6512_v20 = vpop.f32.mrf.mxu0  ;;  %v6537_v21 = vpop.f32.mrf.mxu1 }
 0x555   : > { %v2799_v7 = vpop.f32.mrf.mxu0 }
 0x556   : > { %v2800_v25 = vadd.f32 %v2799_v7, %v2726_v3 }
 0x557   : > { %v6522_v1 = vpop.f32.mrf.mxu0 }
 0x558   : > { %v2874_v5 = vadd.f32 %v2873_v61, %v2800_v25  ;;  %v6947_v61 = vmov 3  }
 0x559   : > { %v2947_v6 = vpop.f32.mrf.mxu0  ;;  %6856 = vset.pattern.permute.xlu1 %v6947_v61 }
 0x55a   : > { %v2948_v10 = vadd.f32 %v2947_v6, %v2874_v5 }
 0x55b   : > { %v6532_v16 = vpop.f32.mrf.mxu0 }
 0x55c   : > { %v3020_v18 = vadd.f32 %v3019_v19, %v2948_v10 }
 0x55e   : > { %v3030_v22 = vrot.slane %v3020_v18, %v7381_v62 }
 0x560   : > { %v3031_v24 = vadd.f32 %v3030_v22, %v3025_v23 }
 0x562   : > { %vm3032_vm5 = vcmp.gt.f32.partialorder %v3031_v24, 0.0  ;;  %v3033_v26 = vmul.f32 0.2, %v3031_v24 }
 0x564   : > { %v3034_v27 = vsel %vm3032_vm5, %v3031_v24, %v3033_v26 }
 0x565   : > { %v3035_v28 = vadd.f32 %v3034_v27, %v7387_v14 }
 0x567   : > { %v3036_v29 = vsel %vm2107_vm4, %v3035_v28, -inf }
 0x568   : > { %3037 = vmax.xlane.f32.xlu0 %v3036_v29 }
 0x57e   : > { %3505 = vrot.lane.b32.xlu0 %v7229_v0, %s6946_s24 }
 0x582   : > { %3958 = vperm.xlu0 %6855, %v7375_v44  }
 0x586   : > { %6857 = vset.pattern.permute.xlu0 %v6947_v61 }
 0x5f1   : > { %v3038_v30 = vpop.xlane.xlu0 %3037 }
 0x5f2   : > { %v3039_v31 = vsub.f32 %v3035_v28, %v3038_v30 }
 0x5f4   : > { %v3040_v32 = vmul.f32 1.442695, %v3039_v31 }
 0x5f5   : > { %v3506_v37 = vpop.permute.xlu0 %3505 }
 0x5f6   : > { %6862 = vpow2.f32 %v3040_v32  ;;  %v3509_v39 = vsel %vm169_vm1, %v3506_v37, 0  ;;  %v7477_v51 = vand.u32 4294901760, %v3506_v37 }
 0x5f7   : > { %v3542_v40 = vand.u32 4294901760, %v3509_v39 }
 0x5f8   : > { %v7485_v56 = vsub.f32 %v3506_v37, %v7477_v51 }
 0x5f9   : > { %v7468_v42 = vsub.f32 %v3509_v39, %v3542_v40 }
 0x5fb   : > { %v3620_v46 = vand.u32 4294901760, %v7468_v42 }
 0x5fd   : > { %v3621_v52 = vsub.f32 %v7468_v42, %v3620_v46 }
 0x5ff   : > { %v3622_v57 = vand.u32 4294901760, %v3621_v52 }
 0x603   : > { %v6863_v34 = vpop.eup %6862 }
 0x604   : > { %v3042_v35 = vsel %vm2107_vm4, %v6863_v34, 0.0 }
 0x605   : > { %3043 = vadd.xlane.f32.xlu1 %v3042_v35 }
 0x616   : > { %3503 = vrot.lane.b32.xlu1 %v7279_v63, %s6946_s24 }
 0x68e   : > { %v3044_v36 = vpop.xlane.xlu1 %3043 }
 0x68f   : > { %6864 = vrcp.f32 %v3044_v36 }
 0x692   : > { %v3504_v17 = vpop.permute.xlu1 %3503 }
 0x693   : > { %v3507_v47 = vsel %vm169_vm1, %v3504_v17, 0 }
 0x694   : > { %v3577_v50 = vand.u32 4294901760, %v3507_v47 }
 0x696   : > { %v3578_v54 = vsub.f32 %v3507_v47, %v3577_v50 }
 0x698   : > { %v3579_v58 = vand.u32 4294901760, %v3578_v54 }
 0x69a   : > { %v3580_v59 = vsub.f32 %v3578_v54, %v3579_v58 }
 0x69c   : > { %v6865_v41 = vpop.eup %6864 }
 0x69d   : > { %v3046_v11 = vmul.f32 %v6865_v41, %v6863_v34 }
 0x69f   : > { %v3049_v43 = vsel %vm2107_vm4, %v3046_v11, 0  ;;  %v3959_v11 = vpop.permute.xlu0 %3958 }
 0x6a0   : > { %v3117_v45 = vand.u32 4294901760, %v3049_v43 }
 0x6a2   : > { %v3118_v48 = vsub.f32 %v3049_v43, %v3117_v45  ;;  %6546 = vmatmul.mubr.f32.vlgmr.msra.gmra.mxu1 %v3117_v45 }
 0x6a3   : > { %6554 = vmatpush3.msra.mxu1 %v7404_v33  ;;  %6555 = vmatprep.mubr.msk.f32.mxu1 %vm6941_vm0, %v6940_v2 }
 0x6a4   : > { %6563 = vmatprep.subr.mxu1 %v6940_v2  ;;  %v3119_v49 = vand.u32 4294901760, %v3118_v48 }
 0x6a6   : > { %6556 = vmatmul.mubr.f32.vlgmr.msra.gmra.mxu1 %v3119_v49  ;;  %v3120_v53 = vsub.f32 %v3118_v48, %v3119_v49 }
 0x6a7   : > { %6564 = vmatpush3.msra.mxu1 %v7404_v33  ;;  %6565 = vmatprep.mubr.msk.f32.mxu1 %vm6941_vm0, %v6940_v2  ;;  %v4094_v33 = vand.u32 4294901760, %v7485_v56 }
 0x6a8   : > { %6573 = vmatprep.subr.mxu1 %v6940_v2  ;;  %v3121_v55 = vand.u32 4294901760, %v3120_v53 }
 0x6a9   : > { %v4095_v60 = vsub.f32 %v7485_v56, %v4094_v33 }
 0x6aa   : > { %6541 = vmatmul.mubr.f32.vlgmr.msra.gmra.mxu0 %v3121_v55  ;;  %6566 = vmatmul.mubr.f32.vlgmr.msra.gmra.mxu1 %v3117_v45 }
 0x6ab   : > { %6549 = vmatpush3.msra.mxu0 %v7412_v38  ;;  %6574 = vmatpush3.xpose.msra.mxu1 %v3622_v57  ;;  %v3581_v38 = vand.u32 4294901760, %v3580_v59 }
 0x6ac   : > { %6550 = vmatprep.mubr.msk.f32.mxu0 %vm6941_vm0, %v6940_v2  ;;  %6558 = vmatprep.subr.mxu0 %v6940_v2 }
 0x6ad   : > { %6575 = vmatprep.mubr.msk.f32.mxu1 %vm6941_vm0, %v6940_v2  ;;  %6583 = vmatprep.subr.mxu1 %v6940_v2 }
 0x6ae   : > { %6551 = vmatmul.mubr.f32.vlgmr.msra.gmra.mxu0 %v3118_v48  ;;  %6576 = vmatmul.mubr.f32.vlgmr.msra.gmra.mxu1 %v3577_v50 }
 0x6af   : > { %6559 = vmatpush3.msra.mxu0 %v3160_v12  ;;  %6584 = vmatpush3.xpose.msra.mxu1 %v3542_v40  ;;  %v4096_v12 = vand.u32 4294901760, %v4095_v60 }
 0x6b0   : > { %6560 = vmatprep.mubr.msk.f32.mxu0 %vm6941_vm0, %v6940_v2  ;;  %6568 = vmatprep.subr.mxu0 %v6940_v2 }
 0x6b1   : > { %6585 = vmatprep.mubr.msk.f32.mxu1 %vm6941_vm0, %v6940_v2  ;;  %6593 = vmatprep.subr.mxu1 %v6940_v2 }
 0x6b2   : > { %6561 = vmatmul.mubr.f32.vlgmr.msra.gmra.mxu0 %v3117_v45  ;;  %6586 = vmatmul.mubr.f32.vlgmr.msra.gmra.mxu1 %v3579_v58 }
 0x6b3   : > { %6569 = vmatpush3.xpose.msra.mxu0 %v3542_v40  ;;  %6594 = vmatpush3.xpose.msra.mxu1 %v3542_v40 }
 0x6b4   : > { %6570 = vmatprep.mubr.msk.f32.mxu0 %vm6941_vm0, %v6940_v2  ;;  %6578 = vmatprep.subr.mxu0 %v6940_v2 }
 0x6b5   : > { %6595 = vmatprep.mubr.msk.f32.mxu1 %vm6941_vm0, %v6940_v2  ;;  %6603 = vmatprep.subr.mxu1 %v6940_v2 }
 0x6b6   : > { %6571 = vmatmul.mubr.f32.vlgmr.msra.gmra.mxu0 %v3581_v38  ;;  %6596 = vmatmul.mubr.f32.vlgmr.msra.gmra.mxu1 %v3577_v50 }
 0x6b7   : > { %6579 = vmatpush3.xpose.msra.mxu0 %v7468_v42  ;;  %6604 = vmatpush3.msra.mxu1 %v4096_v12 }
 0x6b8   : > { %6580 = vmatprep.mubr.msk.f32.mxu0 %vm6941_vm0, %v6940_v2  ;;  %6588 = vmatprep.subr.mxu0 %v6940_v2 }
 0x6b9   : > { %6605 = vmatprep.mubr.msk.f32.mxu1 %vm6941_vm0, %v6940_v2  ;;  %6613 = vmatprep.subr.mxu1 %v6940_v2 }
 0x6ba   : > { %6581 = vmatmul.mubr.f32.vlgmr.msra.gmra.mxu0 %v3578_v54 }
 0x6bb   : > { %6589 = vmatpush3.xpose.msra.mxu0 %v3620_v46  ;;  %6590 = vmatprep.mubr.msk.f32.mxu0 %vm6941_vm0, %v6940_v2 }
 0x6bc   : > { %6598 = vmatprep.subr.mxu0 %v6940_v2 }
 0x6be   : > { %6591 = vmatmul.mubr.f32.vlgmr.msra.gmra.mxu0 %v3577_v50 }
 0x6bf   : > { %6599 = vmatpush3.msra.mxu0 %v7477_v51  ;;  %6600 = vmatprep.mubr.msk.f32.mxu0 %vm6941_vm0, %v6940_v2 }
 0x6c0   : > { %6608 = vmatprep.subr.mxu0 %v6940_v2 }
 0x762   : > { %v3199_v4 = vpop.f32.mrf.mxu1 }
 0x764   : > { %v6547_v8 = vpop.f32.mrf.mxu1 }
 0x766   : > { %v3347_v9 = vpop.f32.mrf.mxu1 }
 0x768   : > { %v6557_v13 = vpop.f32.mrf.mxu1 }
 0x76a   : > { %v3123_v15 = vpop.f32.mrf.mxu0  ;;  %v3493_v19 = vpop.f32.mrf.mxu1 }
 0x76b   : > { %v3200_v20 = vadd.f32 %v3199_v4, %v3123_v15 }
 0x76c   : > { %v6542_v21 = vpop.f32.mrf.mxu0  ;;  %v6567_v3 = vpop.f32.mrf.mxu1 }
 0x76e   : > { %v3273_v7 = vpop.f32.mrf.mxu0  ;;  %v3659_v25 = vpop.f32.mrf.mxu1 }
 0x76f   : > { %v3274_v1 = vadd.f32 %v3273_v7, %v3200_v20 }
 0x770   : > { %v6552_v5 = vpop.f32.mrf.mxu0  ;;  %v6577_v6 = vpop.f32.mrf.mxu1 }
 0x771   : > { %v3348_v10 = vadd.f32 %v3347_v9, %v3274_v1 }
 0x772   : > { %v3421_v16 = vpop.f32.mrf.mxu0  ;;  %v3807_v18 = vpop.f32.mrf.mxu1 }
 0x773   : > { %v3422_v22 = vadd.f32 %v3421_v16, %v3348_v10 }
 0x774   : > { %v6562_v23 = vpop.f32.mrf.mxu0  ;;  %v6587_v24 = vpop.f32.mrf.mxu1 }
 0x775   : > { %v7526_v26 = vadd.f32 %v3493_v19, %v3422_v22 }
 0x776   : > { %v3583_v27 = vpop.f32.mrf.mxu0  ;;  %v3953_v28 = vpop.f32.mrf.mxu1 }
 0x777   : > { %v3660_v31 = vadd.f32 %v3659_v25, %v3583_v27 }
 0x778   : > { %v6572_v29 = vpop.f32.mrf.mxu0  ;;  %v6597_v30 = vpop.f32.mrf.mxu1 }
 0x77a   : > { %v3733_v32 = vpop.f32.mrf.mxu0 }
 0x77b   : > { %v3734_v34 = vadd.f32 %v3733_v32, %v3660_v31 }
 0x77c   : > { %v6582_v35 = vpop.f32.mrf.mxu0 }
 0x77d   : > { %v3808_v36 = vadd.f32 %v3807_v18, %v3734_v34 }
 0x77e   : > { %v3881_v37 = vpop.f32.mrf.mxu0 }
 0x77f   : > { %v3882_v39 = vadd.f32 %v3881_v37, %v3808_v36 }
 0x780   : > { %v6592_v40 = vpop.f32.mrf.mxu0 }
 0x781   : > { %v3954_v41 = vadd.f32 %v3953_v28, %v3882_v39 }
 0x783   : > { %v3964_v42 = vrot.slane %v3954_v41, %v7381_v62 }
 0x785   : > { %v3965_v17 = vadd.f32 %v3964_v42, %v3959_v11 }
 0x787   : > { %vm3966_vm6 = vcmp.gt.f32.partialorder %v3965_v17, 0.0  ;;  %v3967_v43 = vmul.f32 0.2, %v3965_v17 }
 0x789   : > { %v3968_v45 = vsel %vm3966_vm6, %v3965_v17, %v3967_v43 }
 0x78a   : > { %v3969_v46 = vadd.f32 %v3968_v45, %v7387_v14 }
 0x78c   : > { %v3970_v47 = vsel %vm2107_vm4, %v3969_v46, -inf }
 0x78d   : > { %3971 = vmax.xlane.f32.xlu1 %v3970_v47 }
 0x79e   : > { %4437 = vrot.lane.b32.xlu1 %v7279_v63, %s6948_s25 }
 0x7a2   : > { %4892 = vperm.xlu1 %6856, %v7375_v44  }
 0x816   : > { %v3972_v48 = vpop.xlane.xlu1 %3971 }
 0x817   : > { %v3973_v49 = vsub.f32 %v3969_v46, %v3972_v48 }
 0x819   : > { %v3974_v50 = vmul.f32 1.442695, %v3973_v49 }
 0x81a   : > { %v4438_v38 = vpop.permute.xlu1 %4437 }
 0x81b   : > { %6866 = vpow2.f32 %v3974_v50  ;;  %v4441_v61 = vsel %vm169_vm1, %v4438_v38, 0 }
 0x828   : > { %v6867_v52 = vpop.eup %6866 }
 0x829   : > { %v3976_v53 = vsel %vm2107_vm4, %v6867_v52, 0.0 }
 0x82a   : > { %3977 = vadd.xlane.f32.xlu0 %v3976_v53 }
 0x840   : > { %4439 = vrot.lane.b32.xlu0 %v7229_v0, %s6948_s25  ;;  %v4511_v0 = vand.u32 4294901760, %v4441_v61 }
 0x842   : > { %v4512_v20 = vsub.f32 %v4441_v61, %v4511_v0 }
 0x844   : > { %v4513_v25 = vand.u32 4294901760, %v4512_v20 }
 0x846   : > { %v4514_v1 = vsub.f32 %v4512_v20, %v4513_v25 }
 0x8b3   : > { %v3978_v54 = vpop.xlane.xlu0 %3977 }
 0x8b4   : > { %6868 = vrcp.f32 %v3978_v54 }
 0x8b7   : > { %v4440_v55 = vpop.permute.xlu0 %4439 }
 0x8b8   : > { %v4443_v57 = vsel %vm169_vm1, %v4440_v55, 0  ;;  %v7545_v13 = vand.u32 4294901760, %v4440_v55 }
 0x8b9   : > { %v4476_v58 = vand.u32 4294901760, %v4443_v57 }
 0x8ba   : > { %v7553_v3 = vsub.f32 %v4440_v55, %v7545_v13 }
 0x8bb   : > { %v7536_v63 = vsub.f32 %v4443_v57, %v4476_v58 }
 0x8bd   : > { %v4554_v4 = vand.u32 4294901760, %v7536_v63 }
 0x8bf   : > { %v4555_v15 = vsub.f32 %v7536_v63, %v4554_v4 }
 0x8c1   : > { %v6869_v59 = vpop.eup %6868  ;;  %v4556_v7 = vand.u32 4294901760, %v4555_v15 }
 0x8c2   : > { %v3980_v44 = vmul.f32 %v6869_v59, %v6867_v52 }
 0x8c4   : > { %v3983_v60 = vsel %vm2107_vm4, %v3980_v44, 0 }
 0x8c5   : > { %v4051_v12 = vand.u32 4294901760, %v3983_v60 }
 0x8c7   : > { %v4052_v8 = vsub.f32 %v3983_v60, %v4051_v12  ;;  %6606 = vmatmul.mubr.f32.vlgmr.msra.gmra.mxu1 %v4051_v12 }
 0x8c8   : > { %6614 = vmatpush3.msra.mxu1 %v7477_v51  ;;  %6615 = vmatprep.mubr.msk.f32.mxu1 %vm6941_vm0, %v6940_v2 }
 0x8c9   : > { %6623 = vmatprep.subr.mxu1 %v6940_v2  ;;  %v4053_v9 = vand.u32 4294901760, %v4052_v8 }
 0x8cb   : > { %6616 = vmatmul.mubr.f32.vlgmr.msra.gmra.mxu1 %v4053_v9  ;;  %v4054_v19 = vsub.f32 %v4052_v8, %v4053_v9 }
 0x8cc   : > { %6624 = vmatpush3.msra.mxu1 %v7477_v51  ;;  %6625 = vmatprep.mubr.msk.f32.mxu1 %vm6941_vm0, %v6940_v2  ;;  %v5028_v51 = vand.u32 4294901760, %v7553_v3 }
 0x8cd   : > { %6633 = vmatprep.subr.mxu1 %v6940_v2  ;;  %v4055_v21 = vand.u32 4294901760, %v4054_v19 }
 0x8ce   : > { %v5029_v5 = vsub.f32 %v7553_v3, %v5028_v51 }
 0x8cf   : > { %6601 = vmatmul.mubr.f32.vlgmr.msra.gmra.mxu0 %v4055_v21  ;;  %6626 = vmatmul.mubr.f32.vlgmr.msra.gmra.mxu1 %v4051_v12 }
 0x8d0   : > { %6609 = vmatpush3.msra.mxu0 %v7485_v56  ;;  %6634 = vmatpush3.xpose.msra.mxu1 %v4556_v7  ;;  %v4515_v56 = vand.u32 4294901760, %v4514_v1 }
 0x8d1   : > { %6610 = vmatprep.mubr.msk.f32.mxu0 %vm6941_vm0, %v6940_v2  ;;  %6618 = vmatprep.subr.mxu0 %v6940_v2 }
 0x8d2   : > { %6635 = vmatprep.mubr.msk.f32.mxu1 %vm6941_vm0, %v6940_v2  ;;  %6643 = vmatprep.subr.mxu1 %v6940_v2 }
 0x8d3   : > { %6611 = vmatmul.mubr.f32.vlgmr.msra.gmra.mxu0 %v4052_v8  ;;  %6636 = vmatmul.mubr.f32.vlgmr.msra.gmra.mxu1 %v4511_v0 }
 0x8d4   : > { %6619 = vmatpush3.msra.mxu0 %v4094_v33  ;;  %6644 = vmatpush3.xpose.msra.mxu1 %v4476_v58  ;;  %v5030_v33 = vand.u32 4294901760, %v5029_v5  ;;  %v148_v5 = vld [vmem:[%s7876_s1 + $0x40] sm:$0xff] }
 0x8d5   : > { %6620 = vmatprep.mubr.msk.f32.mxu0 %vm6941_vm0, %v6940_v2  ;;  %6628 = vmatprep.subr.mxu0 %v6940_v2 }
 0x8d6   : > { %6645 = vmatprep.mubr.msk.f32.mxu1 %vm6941_vm0, %v6940_v2  ;;  %6653 = vmatprep.subr.mxu1 %v6940_v2 }
 0x8d7   : > { %6621 = vmatmul.mubr.f32.vlgmr.msra.gmra.mxu0 %v4051_v12  ;;  %6646 = vmatmul.mubr.f32.vlgmr.msra.gmra.mxu1 %v4513_v25 }
 0x8d8   : > { %6629 = vmatpush3.xpose.msra.mxu0 %v4476_v58  ;;  %6654 = vmatpush3.xpose.msra.mxu1 %v4476_v58  ;;  %v4893_v58 = vpop.permute.xlu1 %4892 }
 0x8d9   : > { %6630 = vmatprep.mubr.msk.f32.mxu0 %vm6941_vm0, %v6940_v2  ;;  %6638 = vmatprep.subr.mxu0 %v6940_v2 }
 0x8da   : > { %6655 = vmatprep.mubr.msk.f32.mxu1 %vm6941_vm0, %v6940_v2  ;;  %6663 = vmatprep.subr.mxu1 %v6940_v2 }
 0x8db   : > { %6631 = vmatmul.mubr.f32.vlgmr.msra.gmra.mxu0 %v4515_v56  ;;  %6656 = vmatmul.mubr.f32.vlgmr.msra.gmra.mxu1 %v4511_v0  ;;  %v7634_v56 = vand.u32 4294901760, %v148_v5 }
 0x8dc   : > { %6639 = vmatpush3.xpose.msra.mxu0 %v7536_v63  ;;  %6664 = vmatpush3.msra.mxu1 %v5030_v33 }
 0x8dd   : > { %6640 = vmatprep.mubr.msk.f32.mxu0 %vm6941_vm0, %v6940_v2  ;;  %6648 = vmatprep.subr.mxu0 %v6940_v2 }
 0x8de   : > { %6665 = vmatprep.mubr.msk.f32.mxu1 %vm6941_vm0, %v6940_v2  ;;  %6673 = vmatprep.subr.mxu1 %v6940_v2 }
 0x8df   : > { %6641 = vmatmul.mubr.f32.vlgmr.msra.gmra.mxu0 %v4512_v20 }
 0x8e0   : > { %6649 = vmatpush3.xpose.msra.mxu0 %v4554_v4  ;;  %6650 = vmatprep.mubr.msk.f32.mxu0 %vm6941_vm0, %v6940_v2 }
 0x8e1   : > { %6658 = vmatprep.subr.mxu0 %v6940_v2 }
 0x8e3   : > { %6651 = vmatmul.mubr.f32.vlgmr.msra.gmra.mxu0 %v4511_v0 }
 0x8e4   : > { %6659 = vmatpush3.msra.mxu0 %v7545_v13  ;;  %6660 = vmatprep.mubr.msk.f32.mxu0 %vm6941_vm0, %v6940_v2 }
 0x8e5   : > { %6668 = vmatprep.subr.mxu0 %v6940_v2 }
 0x987   : > { %v4133_v6 = vpop.f32.mrf.mxu1 }
 0x989   : > { %v6607_v10 = vpop.f32.mrf.mxu1 }
 0x98a   : > { %v7642_v10 = vsub.f32 %v148_v5, %v7634_v56 }
 0x98b   : > { %v4281_v16 = vpop.f32.mrf.mxu1 }
 0x98d   : > { %v6617_v18 = vpop.f32.mrf.mxu1 }
 0x98f   : > { %v4057_v22 = vpop.f32.mrf.mxu0  ;;  %v4427_v23 = vpop.f32.mrf.mxu1 }
 0x990   : > { %v4134_v24 = vadd.f32 %v4133_v6, %v4057_v22  ;;  %v5488_v22 = vand.u32 4294901760, %v7642_v10 }
 0x991   : > { %v6602_v27 = vpop.f32.mrf.mxu0  ;;  %v6627_v28 = vpop.f32.mrf.mxu1 }
 0x992   : > { %v5489_v27 = vsub.f32 %v7642_v10, %v5488_v22 }
 0x993   : > { %v4207_v29 = vpop.f32.mrf.mxu0  ;;  %v4593_v30 = vpop.f32.mrf.mxu1 }
 0x994   : > { %v4208_v31 = vadd.f32 %v4207_v29, %v4134_v24 }
 0x995   : > { %v6612_v32 = vpop.f32.mrf.mxu0  ;;  %v6637_v34 = vpop.f32.mrf.mxu1 }
 0x996   : > { %v4282_v35 = vadd.f32 %v4281_v16, %v4208_v31  ;;  %v146_v34 = vld [vmem:[%s7876_s1 + $0x30] sm:$0xff] }
 0x997   : > { %v4355_v36 = vpop.f32.mrf.mxu0  ;;  %v4741_v37 = vpop.f32.mrf.mxu1 }
 0x998   : > { %v4356_v39 = vadd.f32 %v4355_v36, %v4282_v35  ;;  %v7671_v35 = vand.u32 4294901760, %v146_v34 }
 0x999   : > { %v6622_v40 = vpop.f32.mrf.mxu0  ;;  %v6647_v41 = vpop.f32.mrf.mxu1 }
 0x99a   : > { %v4428_v42 = vadd.f32 %v4427_v23, %v4356_v39  ;;  %v7677_v39 = vsub.f32 %v146_v34, %v7671_v35 }
 0x99b   : > { %v4517_v11 = vpop.f32.mrf.mxu0  ;;  %v4887_v17 = vpop.f32.mrf.mxu1 }
 0x99c   : > { %v4594_v46 = vadd.f32 %v4593_v30, %v4517_v11  ;;  %v5490_v30 = vand.u32 4294901760, %v5489_v27  ;;  %v5502_v11 = vand.u32 4294901760, %v7677_v39 }
 0x99d   : > { %v6632_v43 = vpop.f32.mrf.mxu0  ;;  %v6657_v45 = vpop.f32.mrf.mxu1 }
 0x99f   : > { %v4667_v47 = vpop.f32.mrf.mxu0 }
 0x9a0   : > { %v4668_v48 = vadd.f32 %v4667_v47, %v4594_v46  ;;  %v143_v46 = vld [vmem:[%s7876_s1 + $0x18] sm:$0xff]  ;;  %v5503_v47 = vsub.f32 %v7677_v39, %v5502_v11 }
 0x9a1   : > { %v6642_v49 = vpop.f32.mrf.mxu0 }
 0x9a2   : > { %v4742_v50 = vadd.f32 %v4741_v37, %v4668_v48  ;;  %v145_v37 = vld [vmem:[%s7876_s1 + $0x28] sm:$0xff] }
 0x9a3   : > { %v4815_v52 = vpop.f32.mrf.mxu0  ;;  %v7679_v40 = vand.u32 4294901760, %v145_v37 }
 0x9a4   : > { %v4816_v53 = vadd.f32 %v4815_v52, %v4742_v50  ;;  %v7704_v50 = vand.u32 4294901760, %v143_v46 }
 0x9a5   : > { %v6652_v54 = vpop.f32.mrf.mxu0 }
 0x9a6   : > { %v4888_v55 = vadd.f32 %v4887_v17, %v4816_v53  ;;  %v7688_v17 = vsub.f32 %v145_v37, %v7679_v40  ;;  %v142_v54 = vld [vmem:[%s7876_s1 + $0x10] sm:$0xff] }
 0x9a8   : > { %v4898_v57 = vrot.slane %v4888_v55, %v7381_v62  ;;  %v5509_v48 = vand.u32 4294901760, %v7688_v17  ;;  %v5504_v55 = vand.u32 4294901760, %v5503_v47 }
 0x9aa   : > { %v4899_v59 = vadd.f32 %v4898_v57, %v4893_v58  ;;  %v5510_v57 = vsub.f32 %v7688_v17, %v5509_v48 }
 0x9ac   : > { %vm4900_vm7 = vcmp.gt.f32.partialorder %v4899_v59, 0.0  ;;  %v4901_v63 = vmul.f32 0.2, %v4899_v59 }
 0x9ae   : > { %v4902_v44 = vsel %vm4900_vm7, %v4899_v59, %v4901_v63 }
 0x9af   : > { %v4903_v60 = vadd.f32 %v4902_v44, %v7387_v14  ;;  %v7717_v44 = vsub.f32 %v143_v46, %v7704_v50 }
 0x9b1   : > { %v4904_v38 = vsel %vm2107_vm4, %v4903_v60, -inf }
 0x9b2   : > { %4905 = vmax.xlane.f32.xlu0 %v4904_v38 }
 0x9c8   : > { %3498 = vrot.lane.b32.xlu0 %v7526_v26, %s6949_s26 }
 0xa3b   : > { %v4906_v12 = vpop.xlane.xlu0 %4905 }
 0xa3c   : > { %v4907_v61 = vsub.f32 %v4903_v60, %v4906_v12  ;;  %v7719_v60 = vand.u32 4294901760, %v142_v54  ;;  %v5511_v12 = vand.u32 4294901760, %v5510_v57 }
 0xa3e   : > { %v4908_v4 = vmul.f32 1.442695, %v4907_v61 }
 0xa3f   : > { %v3499_v62 = vpop.permute.xlu0 %3498 }
 0xa40   : > { %6870 = vpow2.f32 %v4908_v4  ;;  %3502 = vst.msk [vmem:[%s7456_s23] sm:$0xff] %vm3501_vm8, %v3499_v62  ;;  %v5523_v62 = vand.u32 4294901760, %v7717_v44 }
 0xa4d   : > { %v6871_v8 = vpop.eup %6870 }
 0xa4e   : > { %v4910_v0 = vsel %vm2107_vm4, %v6871_v8, 0.0 }
 0xa4f   : > { %4911 = vadd.xlane.f32.xlu1 %v4910_v0 }
 0xa60   : > { %4432 = vrot.lane.b32.xlu1 %v4428_v42, %s6950_s27  ;;  %v144_v42 = vld [vmem:[%s7876_s1 + $0x20] sm:$0xff]  ;;  %s6951_s27 = smov 48  }
 0xa61   : > { %v7690_v43 = vand.u32 4294901760, %v144_v42 }
 0xa63   : > { %v7702_v49 = vsub.f32 %v144_v42, %v7690_v43 }
 0xa65   : > { %v5516_v58 = vand.u32 4294901760, %v7702_v49 }
 0xa67   : > { %v5517_v61 = vsub.f32 %v7702_v49, %v5516_v58 }
 0xad8   : > { %v4912_v14 = vpop.xlane.xlu1 %4911 }
 0xad9   : > { %6872 = vrcp.f32 %v4912_v14  ;;  %v5518_v14 = vand.u32 4294901760, %v5517_v61 }
 0xadc   : > { %v4433_v9 = vpop.permute.xlu1 %4432 }
 0xadd   : > { %4436 = vst.msk [vmem:[%s7456_s23] sm:$0xff] %vm4435_vm9, %v4433_v9 }
 0xae6   : > { %v6873_v26 = vpop.eup %6872 }
 0xae7   : > { %v4914_v15 = vmul.f32 %v6873_v26, %v6871_v8  ;;  %v7728_v8 = vsub.f32 %v142_v54, %v7719_v60  ;;  %v5524_v26 = vsub.f32 %v7717_v44, %v5523_v62 }
 0xae9   : > { %v4917_v19 = vsel %vm2107_vm4, %v4914_v15, 0  ;;  %v5530_v15 = vand.u32 4294901760, %v7728_v8 }
 0xaea   : > { %v4985_v20 = vand.u32 4294901760, %v4917_v19 }
 0xaec   : > { %v4986_v21 = vsub.f32 %v4917_v19, %v4985_v20  ;;  %6666 = vmatmul.mubr.f32.vlgmr.msra.gmra.mxu1 %v4985_v20 }
 0xaed   : > { %6674 = vmatpush3.msra.mxu1 %v7545_v13  ;;  %6675 = vmatprep.mubr.msk.f32.mxu1 %vm6941_vm0, %v6940_v2 }
 0xaee   : > { %6683 = vmatprep.subr.mxu1 %v6940_v2  ;;  %v4987_v7 = vand.u32 4294901760, %v4986_v21 }
 0xaf0   : > { %6676 = vmatmul.mubr.f32.vlgmr.msra.gmra.mxu1 %v4987_v7  ;;  %v4988_v25 = vsub.f32 %v4986_v21, %v4987_v7  ;;  %v5531_v7 = vsub.f32 %v7728_v8, %v5530_v15 }
 0xaf1   : > { %6684 = vmatpush3.msra.mxu1 %v7545_v13  ;;  %6685 = vmatprep.mubr.msk.f32.mxu1 %vm6941_vm0, %v6940_v2  ;;  %v149_v13 = vld [vmem:[%s7876_s1 + $0x48] sm:$0xff] }
 0xaf2   : > { %v4989_v1 = vand.u32 4294901760, %v4988_v25  ;;  %6707 = vmatprep.subr.mxu1 %v6940_v2 }
 0xaf4   : > { %6661 = vmatmul.mubr.f32.vlgmr.msra.gmra.mxu0 %v4989_v1  ;;  %6686 = vmatmul.mubr.f32.vlgmr.msra.gmra.mxu1 %v4985_v20 }
 0xaf5   : > { %6669 = vmatpush3.msra.mxu0 %v7553_v3  ;;  %6670 = vmatprep.mubr.msk.f32.mxu0 %vm6941_vm0, %v6940_v2  ;;  %v147_v3 = vld [vmem:[%s7876_s1 + $0x38] sm:$0xff] }
 0xaf6   : > { %6678 = vmatprep.subr.mxu0 %v6940_v2  ;;  %6723 = vmatprep.mubr.msk.f32.mxu1 %vm6941_vm0, %v6940_v2  ;;  %v7636_v33 = vand.u32 4294901760, %v147_v3 }
 0xaf8   : > { %6671 = vmatmul.mubr.f32.vlgmr.msra.gmra.mxu0 %v4986_v21  ;;  %v7645_v16 = vsub.f32 %v147_v3, %v7636_v33  ;;  %v5525_v21 = vand.u32 4294901760, %v5524_v26 }
 0xaf9   : > { %6679 = vmatpush3.msra.mxu0 %v5028_v51  ;;  %6680 = vmatprep.mubr.msk.f32.mxu0 %vm6941_vm0, %v6940_v2  ;;  %v7632_v51 = vand.u32 4294901760, %v149_v13 }
 0xafa   : > { %6688 = vmatprep.subr.mxu0 %v6940_v2  ;;  %v5495_v23 = vand.u32 4294901760, %v7645_v16 }
 0xafb   : > { %v7639_v6 = vsub.f32 %v149_v13, %v7632_v51  ;;  %v5532_v13 = vand.u32 4294901760, %v5531_v7 }
 0xafc   : > { %6681 = vmatmul.mubr.f32.vlgmr.msra.gmra.mxu0 %v4985_v20  ;;  %v5496_v28 = vsub.f32 %v7645_v16, %v5495_v23 }
 0xafd   : > { %6704 = vmatprep.mubr.msk.f32.mxu0 %vm6941_vm0, %v6940_v2  ;;  %6689 = vmatpush3.msra.mxu0 %v7632_v51  ;;  %v5481_v18 = vand.u32 4294901760, %v7639_v6 }
 0xafe   : > { %6690 = vmatprep.subr.mxu0 %v6940_v2  ;;  %v5497_v31 = vand.u32 4294901760, %v5496_v28 }
 0xaff   : > { %6691 = vmatpush3.msra.mxu0 %v7634_v56  ;;  %v5482_v24 = vsub.f32 %v7639_v6, %v5481_v18 }
 0xb00   : > { %6692 = vmatprep.subr.mxu0 %v6940_v2 }
 0xb01   : > { %6693 = vmatpush3.msra.mxu0 %v7636_v33  ;;  %v5483_v29 = vand.u32 4294901760, %v5482_v24 }
 0xb02   : > { %6694 = vmatprep.subr.mxu0 %v6940_v2 }
 0xb03   : > { %6708 = vmatpush3.msra.mxu1 %v5483_v29  ;;  %6695 = vmatpush3.msra.mxu0 %v7671_v35 }
 0xb04   : > { %6709 = vmatprep.subr.mxu1 %v6940_v2  ;;  %6696 = vmatprep.subr.mxu0 %v6940_v2 }
 0xb05   : > { %6710 = vmatpush3.msra.mxu1 %v5490_v30  ;;  %6697 = vmatpush3.msra.mxu0 %v7679_v40 }
 0xb06   : > { %6711 = vmatprep.subr.mxu1 %v6940_v2  ;;  %6698 = vmatprep.subr.mxu0 %v6940_v2 }
 0xb07   : > { %6712 = vmatpush3.msra.mxu1 %v5497_v31  ;;  %6699 = vmatpush3.msra.mxu0 %v7690_v43 }
 0xb08   : > { %6713 = vmatprep.subr.mxu1 %v6940_v2  ;;  %6700 = vmatprep.subr.mxu0 %v6940_v2 }
 0xb09   : > { %6701 = vmatpush3.msra.mxu0 %v7704_v50  ;;  %6714 = vmatpush3.msra.mxu1 %v5504_v55 }
 0xb0a   : > { %6702 = vmatprep.subr.mxu0 %v6940_v2  ;;  %6715 = vmatprep.subr.mxu1 %v6940_v2 }
 0xb0b   : > { %6703 = vmatpush3.msra.mxu0 %v7719_v60  ;;  %6716 = vmatpush3.msra.mxu1 %v5511_v12 }
 0xb0c   : > { %6726 = vmatprep.subr.mxu0 %v6940_v2  ;;  %6717 = vmatprep.subr.mxu1 %v6940_v2 }
 0xb0d   : > { %6718 = vmatpush3.msra.mxu1 %v5518_v14 }
 0xb0e   : > { %6719 = vmatprep.subr.mxu1 %v6940_v2 }
 0xb0f   : > { %6720 = vmatpush3.msra.mxu1 %v5525_v21 }
 0xb10   : > { %6721 = vmatprep.subr.mxu1 %v6940_v2 }
 0xb11   : > { %6722 = vmatpush3.msra.mxu1 %v5532_v13 }
 0xb12   : > { %6745 = vmatprep.subr.mxu1 %v6940_v2 }
 0xbac   : > { %v5067_v32 = vpop.f32.mrf.mxu1 }
 0xbae   : > { %v6667_v36 = vpop.f32.mrf.mxu1 }
 0xbb0   : > { %v5215_v41 = vpop.f32.mrf.mxu1 }
 0xbb2   : > { %v6677_v45 = vpop.f32.mrf.mxu1 }
 0xbb4   : > { %v4991_v52 = vpop.f32.mrf.mxu0  ;;  %v5361_v53 = vpop.f32.mrf.mxu1 }
 0xbb5   : > { %v5068_v38 = vadd.f32 %v5067_v32, %v4991_v52 }
 0xbb6   : > { %v6662_v59 = vpop.f32.mrf.mxu0  ;;  %v6687_v63 = vpop.f32.mrf.mxu1 }
 0xbb8   : > { %v5141_v4 = vpop.f32.mrf.mxu0 }
 0xbb9   : > { %v5142_v0 = vadd.f32 %v5141_v4, %v5068_v38 }
 0xbba   : > { %v6672_v9 = vpop.f32.mrf.mxu0 }
 0xbbb   : > { %v5216_v19 = vadd.f32 %v5215_v41, %v5142_v0 }
 0xbbc   : > { %v5289_v20 = vpop.f32.mrf.mxu0 }
 0xbbd   : > { %v5290_v25 = vadd.f32 %v5289_v20, %v5216_v19 }
 0xbbe   : > { %v6682_v1 = vpop.f32.mrf.mxu0 }
 0xbbf   : > { %v5362_v5 = vadd.f32 %v5361_v53, %v5290_v25 }
 0xbc1   : > { %5366 = vrot.lane.b32.xlu0 %v5362_v5, %s6951_s27 }
 0xc33   : > { %v5367_v3 = vpop.permute.xlu0 %5366 }
 0xc34   : > { %5370 = vst.msk [vmem:[%s7456_s23] sm:$0xff] %vm5369_vm10, %v5367_v3 }
 0xc3b   : > { %v7745_v24 = vld [vmem:[%s7456_s23] sm:$0xff] }
 0xc3c   : > { %v5377_v27 = vsel %vm1101_vm2, %v7745_v24, 0 }
 0xc3d   : > { %v7749_v28 = vand.u32 4294901760, %v5377_v27 }
 0xc3f   : > { %v5453_v29 = vsub.f32 %v5377_v27, %v7749_v28  ;;  %6724 = vmatmul.mubr.f32.vlgmr.msra.gmra.mxu1 %v7749_v28 }
 0xc40   : > { %6746 = vmatpush3.msra.mxu1 %v7632_v51  ;;  %6761 = vmatprep.mubr.msk.f32.mxu1 %vm6941_vm0, %v6940_v2 }
 0xc41   : > { %6747 = vmatprep.subr.mxu1 %v6940_v2  ;;  %v5454_v30 = vand.u32 4294901760, %v5453_v29 }
 0xc42   : > { %6748 = vmatpush3.msra.mxu1 %v7634_v56 }
 0xc43   : > { %6749 = vmatprep.subr.mxu1 %v6940_v2  ;;  %v5455_v31 = vsub.f32 %v5453_v29, %v5454_v30 }
 0xc44   : > { %6750 = vmatpush3.msra.mxu1 %v7636_v33 }
 0xc45   : > { %6751 = vmatprep.subr.mxu1 %v6940_v2  ;;  %v5456_v32 = vand.u32 4294901760, %v5455_v31 }
 0xc46   : > { %6752 = vmatpush3.msra.mxu1 %v7671_v35 }
 0xc47   : > { %6753 = vmatprep.subr.mxu1 %v6940_v2  ;;  %6705 = vmatmul.mubr.f32.vlgmr.msra.gmra.mxu0 %v5456_v32 }
 0xc48   : > { %6727 = vmatpush3.msra.mxu0 %v7639_v6  ;;  %6754 = vmatpush3.msra.mxu1 %v7679_v40 }
 0xc49   : > { %6728 = vmatprep.subr.mxu0 %v6940_v2  ;;  %6755 = vmatprep.subr.mxu1 %v6940_v2 }
 0xc4a   : > { %6729 = vmatpush3.msra.mxu0 %v7642_v10  ;;  %6756 = vmatpush3.msra.mxu1 %v7690_v43 }
 0xc4b   : > { %6730 = vmatprep.subr.mxu0 %v6940_v2  ;;  %6757 = vmatprep.subr.mxu1 %v6940_v2 }
 0xc4c   : > { %6731 = vmatpush3.msra.mxu0 %v7645_v16  ;;  %6758 = vmatpush3.msra.mxu1 %v7704_v50 }
 0xc4d   : > { %6732 = vmatprep.subr.mxu0 %v6940_v2  ;;  %6759 = vmatprep.subr.mxu1 %v6940_v2 }
 0xc4e   : > { %6733 = vmatpush3.msra.mxu0 %v7677_v39  ;;  %6760 = vmatpush3.msra.mxu1 %v7719_v60 }
 0xc4f   : > { %6734 = vmatprep.subr.mxu0 %v6940_v2  ;;  %6762 = vmatmul.mubr.f32.vlgmr.msra.gmra.mxu1 %v5454_v30 }
 0xc50   : > { %6783 = vmatprep.subr.mxu1 %v6940_v2  ;;  %6735 = vmatpush3.msra.mxu0 %v7688_v17 }
 0xc51   : > { %6784 = vmatpush3.msra.mxu1 %v7632_v51  ;;  %6736 = vmatprep.subr.mxu0 %v6940_v2 }
 0xc52   : > { %6785 = vmatprep.subr.mxu1 %v6940_v2  ;;  %6737 = vmatpush3.msra.mxu0 %v7702_v49 }
 0xc53   : > { %6786 = vmatpush3.msra.mxu1 %v7634_v56  ;;  %6738 = vmatprep.subr.mxu0 %v6940_v2 }
 0xc54   : > { %6787 = vmatprep.subr.mxu1 %v6940_v2  ;;  %6739 = vmatpush3.msra.mxu0 %v7717_v44 }
 0xc55   : > { %6788 = vmatpush3.msra.mxu1 %v7636_v33  ;;  %6740 = vmatprep.subr.mxu0 %v6940_v2 }
 0xc56   : > { %6789 = vmatprep.subr.mxu1 %v6940_v2  ;;  %6741 = vmatpush3.msra.mxu0 %v7728_v8 }
 0xc57   : > { %6742 = vmatprep.mubr.msk.f32.mxu0 %vm6941_vm0, %v6940_v2  ;;  %6790 = vmatpush3.msra.mxu1 %v7671_v35 }
 0xc58   : > { %6743 = vmatmul.mubr.f32.vlgmr.msra.gmra.mxu0 %v5453_v29  ;;  %6764 = vmatprep.subr.mxu0 %v6940_v2 }
 0xc59   : > { %6791 = vmatprep.subr.mxu1 %v6940_v2  ;;  %6765 = vmatpush3.msra.mxu0 %v5481_v18 }
 0xc5a   : > { %6792 = vmatpush3.msra.mxu1 %v7679_v40  ;;  %6766 = vmatprep.subr.mxu0 %v6940_v2 }
 0xc5b   : > { %6793 = vmatprep.subr.mxu1 %v6940_v2  ;;  %6767 = vmatpush3.msra.mxu0 %v5488_v22 }
 0xc5c   : > { %6794 = vmatpush3.msra.mxu1 %v7690_v43  ;;  %6768 = vmatprep.subr.mxu0 %v6940_v2 }
 0xc5d   : > { %6795 = vmatprep.subr.mxu1 %v6940_v2  ;;  %6769 = vmatpush3.msra.mxu0 %v5495_v23  ;;  %v6004_v23 = vld [vmem:[%s7876_s1 + $0xb8] ss:$0 sm:$0xff] }
 0xc5e   : > { %6796 = vmatpush3.msra.mxu1 %v7704_v50  ;;  %6770 = vmatprep.subr.mxu0 %v6940_v2 }
 0xc5f   : > { %6797 = vmatprep.subr.mxu1 %v6940_v2  ;;  %6771 = vmatpush3.msra.mxu0 %v5502_v11 }
 0xc60   : > { %6798 = vmatpush3.msra.mxu1 %v7719_v60  ;;  %6799 = vmatprep.mubr.msk.f32.mxu1 %vm6941_vm0, %v6940_v2 }
 0xc61   : > { %6772 = vmatprep.subr.mxu0 %v6940_v2  ;;  %6800 = vmatmul.mubr.f32.vlgmr.msra.gmra.mxu1 %v7749_v28 }
 0xc62   : > { %6773 = vmatpush3.msra.mxu0 %v5509_v48  ;;  %6780 = vmatprep.mubr.msk.f32.mxu0 %vm6941_vm0, %v6940_v2 }
 0xc63   : > { %6774 = vmatprep.subr.mxu0 %v6940_v2 }
 0xc64   : > { %6775 = vmatpush3.msra.mxu0 %v5516_v58 }
 0xc65   : > { %6776 = vmatprep.subr.mxu0 %v6940_v2 }
 0xc66   : > { %6777 = vmatpush3.msra.mxu0 %v5523_v62 }
 0xc67   : > { %6778 = vmatprep.subr.mxu0 %v6940_v2 }
 0xc68   : > { %6779 = vmatpush3.msra.mxu0 %v5530_v15 }
 0xc69   : > { %6781 = vmatmul.mubr.f32.vlgmr.msra.gmra.mxu0 %v7749_v28 }
 0xcff   : > { %v5569_v51 = vpop.f32.mrf.mxu1 }
 0xd01   : > { %v6725_v56 = vpop.f32.mrf.mxu1 }
 0xd07   : > { %v5458_v33 = vpop.f32.mrf.mxu0 }
 0xd08   : > { %v5459_v34 = vadd.f32 %v6004_v23, %v5458_v33 }
 0xd09   : > { %v6706_v6 = vpop.f32.mrf.mxu0 }
 0xd0a   : > { %v5570_v35 = vadd.f32 %v5569_v51, %v5459_v34 }
 0xd0f   : > { %v5738_v10 = vpop.f32.mrf.mxu1 }
 0xd11   : > { %v6763_v16 = vpop.f32.mrf.mxu1 }
 0xd18   : > { %v5657_v18 = vpop.f32.mrf.mxu0 }
 0xd19   : > { %v5658_v37 = vadd.f32 %v5657_v18, %v5570_v35 }
 0xd1a   : > { %v6744_v22 = vpop.f32.mrf.mxu0 }
 0xd1b   : > { %v5739_v39 = vadd.f32 %v5738_v10, %v5658_v37 }
 0xd21   : > { %v5912_v2 = vpop.f32.mrf.mxu1 }
 0xd23   : > { %v6801_v36 = vpop.f32.mrf.mxu1 }
 0xd29   : > { %v5833_v40 = vpop.f32.mrf.mxu0 }
 0xd2a   : > { %v5834_v41 = vadd.f32 %v5833_v40, %v5739_v39 }
 0xd2b   : > { %v6782_v42 = vpop.f32.mrf.mxu0 }
 0xd2c   : > { %v5913_v11 = vadd.f32 %v5912_v2, %v5834_v41 }
 0xd2e   : > { %v6005_v17 = vmul.f32 -1.442695, %v5913_v11 }
 0xd30   : > { %6874 = vpow2.f32 %v6005_v17 }
 0xd3d   : > { %v6875_v43 = vpop.eup %6874 }
 0xd3e   : > { %v5919_v45 = vadd.f32 1.0, %v6875_v43 }
 0xd40   : > { %6876 = vrcp.f32 %v5919_v45 }
 0xd4d   : > { %v6877_v46 = vpop.eup %6876 }
 0xd4e   : > { %v5922_v47 = vmul.f32 %v6877_v46, %v7745_v24 }
 0xd50   : > { %5923 = vst.msk [vmem:[%s7456_s23] sm:$0xff] %vm1101_vm2, %v5922_v47 }
 0xd51   : > { %6891 = shalt.err (!%p6888_p3)
}
 0xd52   : > { %s6892_s17 = scalar_lea.hbm %s5936_s6, 128  ;;  %s6896_s22 = scalar_lea.hbm %s7877_s2, 256 }
 0xd53   : > { %p6893_p4 = scmp.ne.s32.totalorder %s5936_s6, %s6892_s17  ;;  %p6897_p9 = scmp.lt.s32.totalorder %s5936_s6, %s7877_s2 }
 0xd54   : > { %p6898_p10 = scmp.lt.s32.totalorder %s6896_s22, %s6892_s17 }
 0xd55   : > { %p6894_p7 = pnand %p6893_p4, %p7006_p5 }
 0xd56   : > { %p6899_p11 = por %p6898_p10, %p6897_p9 }
 0xd57   : > { %p6895_p8 = pneg %p6894_p7 }
 0xd59   : > { %p6900_p12 = pnand %p6899_p11, %p6895_p8 }
 0xd5b   : > { %6903 = shalt.err (!%p6900_p12)
}
 0xd5c   : > { %6802 = dma.vmem_to_hbm [thread:$0]  (%p7006_p5), %s5939_s3, 128, %s5936_s6, %s5925_s7  }
 0xd5d PF: > { %p6808_p13 = scmp.ge.s32.totalorder %s6938_s12, 2  ;;  %s5950_s26 = sand.u32 1, %s6926_s9  }
 0xd5e   : > { %s5951_s27 = scalar_lea.sflag [#allocation3], %s5950_s26 }
 0xd5f   : > { %p6805_p0 = pnand %p6808_p13, %p7010_p6 }
 0xd61   : > { %p6806_p1 = pneg %p6805_p0 }
 0xd63   : > { %6921 = dma.done.wait (%p6806_p1), %s5951_s27, 128  }
 0xd64   : > { %6923 = vsyncadd (%p6806_p1), %s5951_s27, 4294967168  ;;  %p12_p2 = scmp.ge.s32.totalorder %s6993_s15, 4   ;;  %s7880_s9 = smov %s6930_s10 }
 0xd65   : > { %s7881_s10 = smov %s6934_s11  ;;  %s7882_s11 = smov %s7004_s18 }
 0xd66   : > { %s7883_s12 = smov %s6993_s15  ;;  %14 = sbr.rel (!%p12_p2) target bundleno = 3 (0x3), region = 63 }
 0xd6b   :  { %5956 = vsyncpa [#allocation3], 1 }
 0xd6c   :  { %5958 = vsyncpa [#allocation3 + $0x1], 1 }

</bundles_post_ra>
